<compile_context>
chip_gen: v6e
topology: v6e:2x2x1
jax: 0.10.0
libtpu: 0.0.40
codegen_flags: <defaults>
</compile_context>

<pallas_src>
import math

import jax
import jax.numpy as jnp
import numpy as np
from jax.experimental import pallas as pl
from jax.experimental.pallas import tpu as pltpu

# ---------------------------------------------------------------------------
# Config (small synthetic shapes consistent with the module)
# ---------------------------------------------------------------------------
B = 2                       # batch
T = 8                       # sequence length
D = 32                      # embed_dim
H = 4                       # attention heads
HD = D // H                 # head dim
FF = 4 * D                  # MLP hidden dim
NUM_PRIM = 2                # config.num_prim_layers
NUM_LAYERS = NUM_PRIM ** 3  # config.num_layers (= number of (q,k,v) triples)
EPS = 1e-5
BT = B * T
NEG_INF = -1e30


def _normalize(x):
    """LayerNorm without affine (gamma/beta are folded into downstream matmuls)."""
    mu = jnp.mean(x, axis=-1, keepdims=True)
    var = jnp.mean((x - mu) ** 2, axis=-1, keepdims=True)
    return (x - mu) * jax.lax.rsqrt(var + EPS)


def _layernorm(x, g, b):
    return _normalize(x) * g + b


# ---------------------------------------------------------------------------
# Fused kernel: all NUM_LAYERS shared transformer blocks in one pallas_call.
# ---------------------------------------------------------------------------
def fused_layers_kernel(v_idx_ref,                     # scalar prefetch (SMEM)
                        x_ref,                         # (BT, D) initial x
                        mask_ref,                      # (B, T, T) additive causal mask
                        wqkv_ref, bqkv_ref,            # (1, D, 3D), (1, 1, 3D) fused QKV
                        gc_ref, bc_ref,                # (1, 1, D)  norms[layer]
                        wp_ref, bp_ref,                # (1, D, D), (1, 1, D)
                        w1_ref, bf1_ref,               # (1, D, FF), (1, 1, FF)
                        w2_ref, bf2_ref,               # (1, FF, D), (1, 1, D)
                        o_ref):                        # (BT, D) residual carry
    layer = pl.program_id(0)

    @pl.when(layer == 0)
    def _():
        o_ref[...] = x_ref[...]                        # seed the carried stream

    x = o_ref[...]                                     # (BT, D), VMEM resident
    shortcut = x

    # pre-attention LayerNorm (qb.norm1 affine folded into wqkv/bqkv) +
    # fused Q|K|V projection (one MXU matmul); score scale folded into Q cols.
    h = _normalize(x)
    qkv = (jnp.dot(h, wqkv_ref[0], preferred_element_type=jnp.float32)
           + bqkv_ref[0, 0])                           # (BT, 3D)

    mask = mask_ref[...]                               # (B, T, T), fetched once

    ctx_parts = []
    for hh in range(H):                                # static, tiny head loop
        q = qkv[:,         hh * HD:        (hh + 1) * HD].reshape(B, T, HD)
        k = qkv[:,     D + hh * HD:    D + (hh + 1) * HD].reshape(B, T, HD)
        v = qkv[:, 2 * D + hh * HD: 2 * D + (hh + 1) * HD].reshape(B, T, HD)
        s = jnp.einsum('bqd,bkd->bqk', q, k,
                       preferred_element_type=jnp.float32) + mask
        s = s - jnp.max(s, axis=-1, keepdims=True)
        e = jnp.exp(s)
        p = e * pl.reciprocal(jnp.sum(e, axis=-1, keepdims=True), approx=True)
        c = jnp.einsum('bqk,bkd->bqd', p, v,
                       preferred_element_type=jnp.float32)
        ctx_parts.append(c.reshape(BT, HD))
    context = jnp.concatenate(ctx_parts, axis=-1)      # (BT, D)

    # shared per-layer norm on the attention context, then output projection
    context = _normalize(context) * gc_ref[0, 0] + bc_ref[0, 0]
    attn_out = jnp.dot(context, wp_ref[0],
                       preferred_element_type=jnp.float32) + bp_ref[0, 0]

    # forward_after_attn: residual, pre-norm (vb.norm2 affine folded into w1),
    # GELU MLP, residual
    x1 = attn_out + shortcut
    h2 = _normalize(x1)
    ff = jax.nn.gelu(jnp.dot(h2, w1_ref[0], preferred_element_type=jnp.float32)
                     + bf1_ref[0, 0], approximate=True)
    ff = jnp.dot(ff, w2_ref[0], preferred_element_type=jnp.float32) + bf2_ref[0, 0]
    o_ref[...] = ff + x1                               # carried to next layer


# ---------------------------------------------------------------------------
# Wrapper: one pallas_call for the whole block sequence
# ---------------------------------------------------------------------------
@jax.jit
def forward_pallas(x, p):
    # index_maps receive (layer, v_idx_ref)
    full2 = lambda l, vi: (0, 0)
    full3 = lambda l, vi: (0, 0, 0)
    by_layer = lambda l, vi: (l, 0, 0)
    by_v = lambda l, vi: (vi[l], 0, 0)

    in_specs = [
        pl.BlockSpec((BT, D), full2),            # x (fetched once)
        pl.BlockSpec((B, T, T), full3),          # additive causal mask (fetched once)
        pl.BlockSpec((1, D, 3 * D), by_layer),   # wqkv  (norm1 affine + scale folded)
        pl.BlockSpec((1, 1, 3 * D), by_layer),   # bqkv
        pl.BlockSpec((1, 1, D), by_layer),       # gc    (shared norm weight)
        pl.BlockSpec((1, 1, D), by_layer),       # bc    (shared norm bias)
        pl.BlockSpec((1, D, D), by_v),           # wp
        pl.BlockSpec((1, 1, D), by_v),           # bp
        pl.BlockSpec((1, D, FF), by_v),          # w1    (norm2 affine folded)
        pl.BlockSpec((1, 1, FF), by_v),          # bf1
        pl.BlockSpec((1, FF, D), by_v),          # w2
        pl.BlockSpec((1, 1, D), by_v),           # bf2
    ]
    out = pl.pallas_call(
        fused_layers_kernel,
        out_shape=jax.ShapeDtypeStruct((BT, D), jnp.float32),
        grid_spec=pltpu.PrefetchScalarGridSpec(
            num_scalar_prefetch=1,
            grid=(NUM_LAYERS,),
            in_specs=in_specs,
            out_specs=pl.BlockSpec((BT, D), full2),
        ),
        compiler_params=pltpu.CompilerParams(
            dimension_semantics=("arbitrary",)),   # layer axis carries x
    )(p['v_idx'], x.reshape(BT, D), p['mask'],
      p['wqkv'], p['bqkv'], p['gc'], p['bc'],
      p['wp'], p['bp'], p['w1'], p['bf1'], p['w2'], p['bf2'])
    return out.reshape(B, T, D)


# ---------------------------------------------------------------------------
# Deterministic init (non-trivial affines/biases so the folds are exercised)
# ---------------------------------------------------------------------------
def init_model(key):
    std = 0.02
    blocks = []
    for _ in range(NUM_PRIM):
        key, *ks = jax.random.split(key, 14)
        blocks.append(dict(
            wq=jax.random.normal(ks[0], (D, D), jnp.float32) * std,
            wk=jax.random.normal(ks[1], (D, D), jnp.float32) * std,
            wv=jax.random.normal(ks[2], (D, D), jnp.float32) * std,
            wp=jax.random.normal(ks[3], (D, D), jnp.float32) * std,
            bp=jax.random.normal(ks[4], (1, D), jnp.float32) * std,
            w1=jax.random.normal(ks[5], (D, FF), jnp.float32) * std,
            bf1=jax.random.normal(ks[6], (1, FF), jnp.float32) * std,
            w2=jax.random.normal(ks[7], (FF, D), jnp.float32) * std,
            bf2=jax.random.normal(ks[8], (1, D), jnp.float32) * std,
            g1=1.0 + jax.random.normal(ks[9], (1, D), jnp.float32) * std,
            be1=jax.random.normal(ks[10], (1, D), jnp.float32) * std,
            g2=1.0 + jax.random.normal(ks[11], (1, D), jnp.float32) * std,
            be2=jax.random.normal(ks[12], (1, D), jnp.float32) * std,
        ))
    norms = []
    for _ in range(NUM_LAYERS):
        key, k1, k2 = jax.random.split(key, 3)
        norms.append((1.0 + jax.random.normal(k1, (1, D), jnp.float32) * std,
                      jax.random.normal(k2, (1, D), jnp.float32) * std))
    return blocks, norms


# ---------------------------------------------------------------------------
# Parameter packing: stacks, fused/fold weights, index arrays, causal mask
# ---------------------------------------------------------------------------
def pack_params(blocks, norms):
    # triple-loop order: block_idx = q*P^2 + k*P + v  (q outer, k middle, v inner)
    idx = np.arange(NUM_LAYERS)
    q_idx = idx // (NUM_PRIM * NUM_PRIM)
    k_idx = (idx // NUM_PRIM) % NUM_PRIM
    v_idx = idx % NUM_PRIM

    def stack(name):
        return jnp.stack([b[name] for b in blocks])

    wq, wk, wv = stack('wq'), stack('wk'), stack('wv')      # (P, D, D)
    g1, be1 = stack('g1'), stack('be1')                     # (P, 1, D)
    g2, be2 = stack('g2'), stack('be2')                     # (P, 1, D)
    w1, bf1 = stack('w1'), stack('bf1')                     # (P, D, FF), (P, 1, FF)

    scale = 1.0 / math.sqrt(HD)
    # per-layer fused Q|K|V weight (q from qb, k from kb, v from vb);
    # the 1/sqrt(head_dim) score scale is folded into the Q columns.
    wcat = jnp.concatenate([wq[q_idx] * scale, wk[k_idx], wv[v_idx]],
                           axis=-1)                         # (L, D, 3D)
    # fold qb.norm1's affine into the matmul:
    #   (xn*g1 + be1) @ Wcat == xn @ (g1 ⊙rows Wcat) + be1 @ Wcat
    bqkv = jnp.einsum('lad,ldh->lah', be1[q_idx], wcat)     # (L, 1, 3D)
    wqkv = wcat * jnp.transpose(g1[q_idx], (0, 2, 1))       # (L, D, 3D)

    # fold vb.norm2's affine into the first MLP matmul (stays per-prim, no dup):
    bf1_f = jnp.einsum('pad,pdh->pah', be2, w1) + bf1       # (P, 1, FF)
    w1_f = w1 * jnp.transpose(g2, (0, 2, 1))                # (P, D, FF)

    causal = jnp.tril(jnp.ones((T, T), dtype=bool))
    mask = jnp.broadcast_to(jnp.where(causal, 0.0, NEG_INF),
                            (B, T, T)).astype(jnp.float32)

    return dict(
        v_idx=jnp.asarray(v_idx, jnp.int32),
        mask=mask,
        wqkv=wqkv, bqkv=bqkv,                               # (L, D, 3D), (L, 1, 3D)
        gc=jnp.stack([g for g, _ in norms]),                # (L, 1, D)
        bc=jnp.stack([b_ for _, b_ in norms]),
        wp=stack('wp'), bp=stack('bp'),
        w1=w1_f, bf1=bf1_f,
        w2=stack('w2'), bf2=stack('bf2'),
    )


# ---------------------------------------------------------------------------
# Pure-JAX reference (unfused math, original params -> validates the folds)
# ---------------------------------------------------------------------------
def _ref_step(x, wq, wk, wv, g1, be1, gc, bc, wp, bp, g2, be2, w1, bf1, w2, bf2):
    shortcut = x
    h = _layernorm(x, g1[0], be1[0])
    q, k, v = h @ wq, h @ wk, h @ wv

    def split(t):
        return t.reshape(B, T, H, HD).transpose(0, 2, 1, 3)

    qh, kh, vh = split(q), split(k), split(v)
    s = jnp.einsum('bhqd,bhkd->bhqk', qh, kh) / math.sqrt(HD)
    mask = jnp.tril(jnp.ones((T, T), bool))
    s = jnp.where(mask, s, NEG_INF)
    p = jax.nn.softmax(s, axis=-1)
    ctx = jnp.einsum('bhqk,bhkd->bhqd', p, vh).transpose(0, 2, 1, 3).reshape(B, T, D)
    ctx = _layernorm(ctx, gc[0], bc[0])
    attn_out = ctx @ wp + bp[0]
    x1 = attn_out + shortcut
    h2 = _layernorm(x1, g2[0], be2[0])
    ff = jax.nn.gelu(h2 @ w1 + bf1[0], approximate=True) @ w2 + bf2[0]
    return ff + x1


def forward_ref(x, blocks, norms):
    block_idx = 0
    for qb in blocks:
        for kb in blocks:
            for vb in blocks:
                gc, bc = norms[block_idx]
                x = _ref_step(x, qb['wq'], kb['wk'], vb['wv'],
                              qb['g1'], qb['be1'], gc, bc,
                              vb['wp'], vb['bp'], vb['g2'], vb['be2'],
                              vb['w1'], vb['bf1'], vb['w2'], vb['bf2'])
                block_idx += 1
    return x


if __name__ == "__main__":
    key = jax.random.PRNGKey(0)
    key, xk = jax.random.split(key)
    x = jax.random.normal(xk, (B, T, D), jnp.float32)

    blocks, norms = init_model(key)
    packed = pack_params(blocks, norms)

    out = jax.block_until_ready(forward_pallas(x, packed))
    ref = jax.block_until_ready(forward_ref(x, blocks, norms))

    # tolerance loosened slightly vs 1e-4: softmax uses the EUP approx reciprocal
    np.testing.assert_allclose(np.asarray(out), np.asarray(ref),
                               rtol=5e-3, atol=5e-3)
    assert out.shape == (B, T, D)
    print("KERNEL_OK")
</pallas_src>

<mosaic_0001>
module attributes {stable_mosaic.version = 11 : i64} {
  func.func @fused_layers_kernel(%arg0: i32, %arg1: memref<8xi32, #tpu.memory_space<smem>>, %arg2: memref<16x32xf32, #tpu.memory_space<vmem>>, %arg3: memref<2x8x8xf32, #tpu.memory_space<vmem>>, %arg4: memref<1x32x96xf32, #tpu.memory_space<vmem>>, %arg5: memref<1x1x96xf32, #tpu.memory_space<vmem>>, %arg6: memref<1x1x32xf32, #tpu.memory_space<vmem>>, %arg7: memref<1x1x32xf32, #tpu.memory_space<vmem>>, %arg8: memref<1x32x32xf32, #tpu.memory_space<vmem>>, %arg9: memref<1x1x32xf32, #tpu.memory_space<vmem>>, %arg10: memref<1x32x128xf32, #tpu.memory_space<vmem>>, %arg11: memref<1x1x128xf32, #tpu.memory_space<vmem>>, %arg12: memref<1x128x32xf32, #tpu.memory_space<vmem>>, %arg13: memref<1x1x32xf32, #tpu.memory_space<vmem>>, %arg14: memref<16x32xf32, #tpu.memory_space<vmem>>) attributes {dimension_semantics = [#tpu.dimension_semantics<arbitrary>], iteration_bounds = array<i64: 8>, scalar_prefetch = 1 : i64, scratch_operands = 0 : i64, tpu.core_type = #tpu.core_type<tc>, window_params = [{pipeline_mode = #tpu.pipeline_mode<synchronous>, transform_indices = @transform_0, window_bounds = array<i64: 16, 32>}, {pipeline_mode = #tpu.pipeline_mode<synchronous>, transform_indices = @transform_1, window_bounds = array<i64: 2, 8, 8>}, {transform_indices = @transform_2, window_bounds = array<i64: 1, 32, 96>}, {transform_indices = @transform_3, window_bounds = array<i64: 1, 1, 96>}, {transform_indices = @transform_4, window_bounds = array<i64: 1, 1, 32>}, {transform_indices = @transform_5, window_bounds = array<i64: 1, 1, 32>}, {transform_indices = @transform_6, window_bounds = array<i64: 1, 32, 32>}, {transform_indices = @transform_7, window_bounds = array<i64: 1, 1, 32>}, {transform_indices = @transform_8, window_bounds = array<i64: 1, 32, 128>}, {transform_indices = @transform_9, window_bounds = array<i64: 1, 1, 128>}, {transform_indices = @transform_10, window_bounds = array<i64: 1, 128, 32>}, {transform_indices = @transform_11, window_bounds = array<i64: 1, 1, 32>}, {pipeline_mode = #tpu.pipeline_mode<synchronous>, transform_indices = @transform_12, window_bounds = array<i64: 16, 32>}]} {
    %c0_i32 = arith.constant 0 : i32
    %0 = arith.cmpi eq, %arg0, %c0_i32 : i32
    %1 = arith.extui %0 : i1 to i32
    %c0_i32_0 = arith.constant 0 : i32
    %2 = arith.cmpi ne, %1, %c0_i32_0 : i32
    scf.if %2 {
      %c0_75 = arith.constant 0 : index
      %c0_76 = arith.constant 0 : index
      %198 = vector.load %arg2[%c0_75, %c0_76] : memref<16x32xf32, #tpu.memory_space<vmem>>, vector<16x32xf32>
      %c0_77 = arith.constant 0 : index
      %c0_78 = arith.constant 0 : index
      %199 = vector.load %arg14[%c0_77, %c0_78] : memref<16x32xf32, #tpu.memory_space<vmem>>, vector<16x32xf32>
      tpu.vector_store %arg14[%c0_77, %c0_78], %198 {strides = array<i32>} : memref<16x32xf32, #tpu.memory_space<vmem>>, vector<16x32xf32>,
    } else {
    }
    %c0 = arith.constant 0 : index
    %c0_1 = arith.constant 0 : index
    %3 = vector.load %arg14[%c0, %c0_1] : memref<16x32xf32, #tpu.memory_space<vmem>>, vector<16x32xf32>
    %cst = arith.constant dense<0.000000e+00> : vector<16xf32>
    %4 = vector.multi_reduction <add>, %3, %cst [1] : vector<16x32xf32> to vector<16xf32>
    %5 = vector.shape_cast %4 : vector<16xf32> to vector<16x1xf32>
    %cst_2 = arith.constant 3.200000e+01 : f32
    %6 = vector.broadcast %cst_2 : f32 to vector<16x1xf32>
    %7 = arith.divf %5, %6 : vector<16x1xf32>
    %8 = vector.broadcast %7 : vector<16x1xf32> to vector<16x32xf32>
    %9 = arith.subf %3, %8 : vector<16x32xf32>
    %10 = arith.mulf %9, %9 : vector<16x32xf32>
    %cst_3 = arith.constant dense<0.000000e+00> : vector<16xf32>
    %11 = vector.multi_reduction <add>, %10, %cst_3 [1] : vector<16x32xf32> to vector<16xf32>
    %12 = vector.shape_cast %11 : vector<16xf32> to vector<16x1xf32>
    %cst_4 = arith.constant 3.200000e+01 : f32
    %13 = vector.broadcast %cst_4 : f32 to vector<16x1xf32>
    %14 = arith.divf %12, %13 : vector<16x1xf32>
    %15 = vector.broadcast %7 : vector<16x1xf32> to vector<16x32xf32>
    %16 = arith.subf %3, %15 : vector<16x32xf32>
    %cst_5 = arith.constant 9.99999974E-6 : f32
    %17 = vector.broadcast %cst_5 : f32 to vector<16x1xf32>
    %18 = arith.addf %14, %17 : vector<16x1xf32>
    %19 = math.rsqrt %18 : vector<16x1xf32>
    %20 = vector.broadcast %19 : vector<16x1xf32> to vector<16x32xf32>
    %21 = arith.mulf %16, %20 : vector<16x32xf32>
    %c0_6 = arith.constant 0 : index
    %c0_7 = arith.constant 0 : index
    %c0_8 = arith.constant 0 : index
    %22 = vector.load %arg4[%c0_6, %c0_7, %c0_8] : memref<1x32x96xf32, #tpu.memory_space<vmem>>, vector<1x32x96xf32>
    %23 = vector.shape_cast %22 : vector<1x32x96xf32> to vector<32x96xf32>
    %cst_9 = arith.constant dense<0.000000e+00> : vector<16x96xf32>
    %24 = tpu.matmul %21, %23, %cst_9 {dimension_numbers = #tpu.dot_dimension_numbers<[1], [0], [0], [1], [0, 0, 1, 1], [], []>} : vector<16x32xf32>, vector<32x96xf32>, vector<16x96xf32> -> vector<16x96xf32>
    %c0_10 = arith.constant 0 : index
    %c0_11 = arith.constant 0 : index
    %c0_12 = arith.constant 0 : index
    %25 = vector.load %arg5[%c0_10, %c0_11, %c0_12] : memref<1x1x96xf32, #tpu.memory_space<vmem>>, vector<1x1x96xf32>
    %26 = vector.shape_cast %25 : vector<1x1x96xf32> to vector<96xf32>
    %27 = vector.shape_cast %26 : vector<96xf32> to vector<1x96xf32>
    %28 = vector.broadcast %27 : vector<1x96xf32> to vector<16x96xf32>
    %29 = arith.addf %24, %28 : vector<16x96xf32>
    %c0_13 = arith.constant 0 : index
    %c0_14 = arith.constant 0 : index
    %c0_15 = arith.constant 0 : index
    %30 = vector.load %arg3[%c0_13, %c0_14, %c0_15] : memref<2x8x8xf32, #tpu.memory_space<vmem>>, vector<2x8x8xf32>
    %31 = vector.extract_strided_slice %29 {offsets = [0, 0], sizes = [16, 8], strides = [1, 1]} : vector<16x96xf32> to vector<16x8xf32>
    %32 = vector.shape_cast %31 : vector<16x8xf32> to vector<2x8x8xf32>
    %33 = vector.extract_strided_slice %29 {offsets = [0, 32], sizes = [16, 8], strides = [1, 1]} : vector<16x96xf32> to vector<16x8xf32>
    %34 = vector.shape_cast %33 : vector<16x8xf32> to vector<2x8x8xf32>
    %35 = vector.extract_strided_slice %29 {offsets = [0, 64], sizes = [16, 8], strides = [1, 1]} : vector<16x96xf32> to vector<16x8xf32>
    %36 = vector.shape_cast %35 : vector<16x8xf32> to vector<2x8x8xf32>
    "tpu.trace_start"() <{level = 10 : i32, message = "bqd,bkd->bqk"}> : () -> ()
    %cst_16 = arith.constant dense<0.000000e+00> : vector<2x8x8xf32>
    %37 = tpu.matmul %32, %34, %cst_16 {dimension_numbers = #tpu.dot_dimension_numbers<[2], [2], [1], [1], [0, 0, 0, 1, 1, 1], [0], [0]>} : vector<2x8x8xf32>, vector<2x8x8xf32>, vector<2x8x8xf32> -> vector<2x8x8xf32>
    "tpu.trace_stop"() : () -> ()
    %38 = arith.addf %37, %30 : vector<2x8x8xf32>
    %cst_17 = arith.constant dense<0xFF800000> : vector<2x8xf32>
    %39 = vector.multi_reduction <maximumf>, %38, %cst_17 [2] : vector<2x8x8xf32> to vector<2x8xf32>
    %40 = vector.shape_cast %39 : vector<2x8xf32> to vector<2x8x1xf32>
    %41 = vector.broadcast %40 : vector<2x8x1xf32> to vector<2x8x8xf32>
    %42 = arith.subf %38, %41 : vector<2x8x8xf32>
    %43 = math.exp %42 : vector<2x8x8xf32>
    %cst_18 = arith.constant dense<0.000000e+00> : vector<2x8xf32>
    %44 = vector.multi_reduction <add>, %43, %cst_18 [2] : vector<2x8x8xf32> to vector<2x8xf32>
    %45 = vector.shape_cast %44 : vector<2x8xf32> to vector<2x8x1xf32>
    %46 = tpu.reciprocal %45 {approx = true} : vector<2x8x1xf32> -> vector<2x8x1xf32>
    %47 = vector.broadcast %46 : vector<2x8x1xf32> to vector<2x8x8xf32>
    %48 = arith.mulf %43, %47 : vector<2x8x8xf32>
    "tpu.trace_start"() <{level = 10 : i32, message = "bqk,bkd->bqd"}> : () -> ()
    %cst_19 = arith.constant dense<0.000000e+00> : vector<2x8x8xf32>
    %49 = tpu.matmul %48, %36, %cst_19 {dimension_numbers = #tpu.dot_dimension_numbers<[2], [1], [1], [2], [0, 0, 0, 1, 1, 2], [0], [0]>} : vector<2x8x8xf32>, vector<2x8x8xf32>, vector<2x8x8xf32> -> vector<2x8x8xf32>
    "tpu.trace_stop"() : () -> ()
    %50 = vector.shape_cast %49 : vector<2x8x8xf32> to vector<16x8xf32>
    %51 = vector.extract_strided_slice %29 {offsets = [0, 8], sizes = [16, 8], strides = [1, 1]} : vector<16x96xf32> to vector<16x8xf32>
    %52 = vector.shape_cast %51 : vector<16x8xf32> to vector<2x8x8xf32>
    %53 = vector.extract_strided_slice %29 {offsets = [0, 40], sizes = [16, 8], strides = [1, 1]} : vector<16x96xf32> to vector<16x8xf32>
    %54 = vector.shape_cast %53 : vector<16x8xf32> to vector<2x8x8xf32>
    %55 = vector.extract_strided_slice %29 {offsets = [0, 72], sizes = [16, 8], strides = [1, 1]} : vector<16x96xf32> to vector<16x8xf32>
    %56 = vector.shape_cast %55 : vector<16x8xf32> to vector<2x8x8xf32>
    "tpu.trace_start"() <{level = 10 : i32, message = "bqd,bkd->bqk"}> : () -> ()
    %cst_20 = arith.constant dense<0.000000e+00> : vector<2x8x8xf32>
    %57 = tpu.matmul %52, %54, %cst_20 {dimension_numbers = #tpu.dot_dimension_numbers<[2], [2], [1], [1], [0, 0, 0, 1, 1, 1], [0], [0]>} : vector<2x8x8xf32>, vector<2x8x8xf32>, vector<2x8x8xf32> -> vector<2x8x8xf32>
    "tpu.trace_stop"() : () -> ()
    %58 = arith.addf %57, %30 : vector<2x8x8xf32>
    %cst_21 = arith.constant dense<0xFF800000> : vector<2x8xf32>
    %59 = vector.multi_reduction <maximumf>, %58, %cst_21 [2] : vector<2x8x8xf32> to vector<2x8xf32>
    %60 = vector.shape_cast %59 : vector<2x8xf32> to vector<2x8x1xf32>
    %61 = vector.broadcast %60 : vector<2x8x1xf32> to vector<2x8x8xf32>
    %62 = arith.subf %58, %61 : vector<2x8x8xf32>
    %63 = math.exp %62 : vector<2x8x8xf32>
    %cst_22 = arith.constant dense<0.000000e+00> : vector<2x8xf32>
    %64 = vector.multi_reduction <add>, %63, %cst_22 [2] : vector<2x8x8xf32> to vector<2x8xf32>
    %65 = vector.shape_cast %64 : vector<2x8xf32> to vector<2x8x1xf32>
    %66 = tpu.reciprocal %65 {approx = true} : vector<2x8x1xf32> -> vector<2x8x1xf32>
    %67 = vector.broadcast %66 : vector<2x8x1xf32> to vector<2x8x8xf32>
    %68 = arith.mulf %63, %67 : vector<2x8x8xf32>
    "tpu.trace_start"() <{level = 10 : i32, message = "bqk,bkd->bqd"}> : () -> ()
    %cst_23 = arith.constant dense<0.000000e+00> : vector<2x8x8xf32>
    %69 = tpu.matmul %68, %56, %cst_23 {dimension_numbers = #tpu.dot_dimension_numbers<[2], [1], [1], [2], [0, 0, 0, 1, 1, 2], [0], [0]>} : vector<2x8x8xf32>, vector<2x8x8xf32>, vector<2x8x8xf32> -> vector<2x8x8xf32>
    "tpu.trace_stop"() : () -> ()
    %70 = vector.shape_cast %69 : vector<2x8x8xf32> to vector<16x8xf32>
    %71 = vector.extract_strided_slice %29 {offsets = [0, 16], sizes = [16, 8], strides = [1, 1]} : vector<16x96xf32> to vector<16x8xf32>
    %72 = vector.shape_cast %71 : vector<16x8xf32> to vector<2x8x8xf32>
    %73 = vector.extract_strided_slice %29 {offsets = [0, 48], sizes = [16, 8], strides = [1, 1]} : vector<16x96xf32> to vector<16x8xf32>
    %74 = vector.shape_cast %73 : vector<16x8xf32> to vector<2x8x8xf32>
    %75 = vector.extract_strided_slice %29 {offsets = [0, 80], sizes = [16, 8], strides = [1, 1]} : vector<16x96xf32> to vector<16x8xf32>
    %76 = vector.shape_cast %75 : vector<16x8xf32> to vector<2x8x8xf32>
    "tpu.trace_start"() <{level = 10 : i32, message = "bqd,bkd->bqk"}> : () -> ()
    %cst_24 = arith.constant dense<0.000000e+00> : vector<2x8x8xf32>
    %77 = tpu.matmul %72, %74, %cst_24 {dimension_numbers = #tpu.dot_dimension_numbers<[2], [2], [1], [1], [0, 0, 0, 1, 1, 1], [0], [0]>} : vector<2x8x8xf32>, vector<2x8x8xf32>, vector<2x8x8xf32> -> vector<2x8x8xf32>
    "tpu.trace_stop"() : () -> ()
    %78 = arith.addf %77, %30 : vector<2x8x8xf32>
    %cst_25 = arith.constant dense<0xFF800000> : vector<2x8xf32>
    %79 = vector.multi_reduction <maximumf>, %78, %cst_25 [2] : vector<2x8x8xf32> to vector<2x8xf32>
    %80 = vector.shape_cast %79 : vector<2x8xf32> to vector<2x8x1xf32>
    %81 = vector.broadcast %80 : vector<2x8x1xf32> to vector<2x8x8xf32>
    %82 = arith.subf %78, %81 : vector<2x8x8xf32>
    %83 = math.exp %82 : vector<2x8x8xf32>
    %cst_26 = arith.constant dense<0.000000e+00> : vector<2x8xf32>
    %84 = vector.multi_reduction <add>, %83, %cst_26 [2] : vector<2x8x8xf32> to vector<2x8xf32>
    %85 = vector.shape_cast %84 : vector<2x8xf32> to vector<2x8x1xf32>
    %86 = tpu.reciprocal %85 {approx = true} : vector<2x8x1xf32> -> vector<2x8x1xf32>
    %87 = vector.broadcast %86 : vector<2x8x1xf32> to vector<2x8x8xf32>
    %88 = arith.mulf %83, %87 : vector<2x8x8xf32>
    "tpu.trace_start"() <{level = 10 : i32, message = "bqk,bkd->bqd"}> : () -> ()
    %cst_27 = arith.constant dense<0.000000e+00> : vector<2x8x8xf32>
    %89 = tpu.matmul %88, %76, %cst_27 {dimension_numbers = #tpu.dot_dimension_numbers<[2], [1], [1], [2], [0, 0, 0, 1, 1, 2], [0], [0]>} : vector<2x8x8xf32>, vector<2x8x8xf32>, vector<2x8x8xf32> -> vector<2x8x8xf32>
    "tpu.trace_stop"() : () -> ()
    %90 = vector.shape_cast %89 : vector<2x8x8xf32> to vector<16x8xf32>
    %91 = vector.extract_strided_slice %29 {offsets = [0, 24], sizes = [16, 8], strides = [1, 1]} : vector<16x96xf32> to vector<16x8xf32>
    %92 = vector.shape_cast %91 : vector<16x8xf32> to vector<2x8x8xf32>
    %93 = vector.extract_strided_slice %29 {offsets = [0, 56], sizes = [16, 8], strides = [1, 1]} : vector<16x96xf32> to vector<16x8xf32>
    %94 = vector.shape_cast %93 : vector<16x8xf32> to vector<2x8x8xf32>
    %95 = vector.extract_strided_slice %29 {offsets = [0, 88], sizes = [16, 8], strides = [1, 1]} : vector<16x96xf32> to vector<16x8xf32>
    %96 = vector.shape_cast %95 : vector<16x8xf32> to vector<2x8x8xf32>
    "tpu.trace_start"() <{level = 10 : i32, message = "bqd,bkd->bqk"}> : () -> ()
    %cst_28 = arith.constant dense<0.000000e+00> : vector<2x8x8xf32>
    %97 = tpu.matmul %92, %94, %cst_28 {dimension_numbers = #tpu.dot_dimension_numbers<[2], [2], [1], [1], [0, 0, 0, 1, 1, 1], [0], [0]>} : vector<2x8x8xf32>, vector<2x8x8xf32>, vector<2x8x8xf32> -> vector<2x8x8xf32>
    "tpu.trace_stop"() : () -> ()
    %98 = arith.addf %97, %30 : vector<2x8x8xf32>
    %cst_29 = arith.constant dense<0xFF800000> : vector<2x8xf32>
    %99 = vector.multi_reduction <maximumf>, %98, %cst_29 [2] : vector<2x8x8xf32> to vector<2x8xf32>
    %100 = vector.shape_cast %99 : vector<2x8xf32> to vector<2x8x1xf32>
    %101 = vector.broadcast %100 : vector<2x8x1xf32> to vector<2x8x8xf32>
    %102 = arith.subf %98, %101 : vector<2x8x8xf32>
    %103 = math.exp %102 : vector<2x8x8xf32>
    %cst_30 = arith.constant dense<0.000000e+00> : vector<2x8xf32>
    %104 = vector.multi_reduction <add>, %103, %cst_30 [2] : vector<2x8x8xf32> to vector<2x8xf32>
    %105 = vector.shape_cast %104 : vector<2x8xf32> to vector<2x8x1xf32>
    %106 = tpu.reciprocal %105 {approx = true} : vector<2x8x1xf32> -> vector<2x8x1xf32>
    %107 = vector.broadcast %106 : vector<2x8x1xf32> to vector<2x8x8xf32>
    %108 = arith.mulf %103, %107 : vector<2x8x8xf32>
    "tpu.trace_start"() <{level = 10 : i32, message = "bqk,bkd->bqd"}> : () -> ()
    %cst_31 = arith.constant dense<0.000000e+00> : vector<2x8x8xf32>
    %109 = tpu.matmul %108, %96, %cst_31 {dimension_numbers = #tpu.dot_dimension_numbers<[2], [1], [1], [2], [0, 0, 0, 1, 1, 2], [0], [0]>} : vector<2x8x8xf32>, vector<2x8x8xf32>, vector<2x8x8xf32> -> vector<2x8x8xf32>
    "tpu.trace_stop"() : () -> ()
    %110 = vector.shape_cast %109 : vector<2x8x8xf32> to vector<16x8xf32>
    %111 = tpu.concatenate %50, %70, %90, %110 in 1 : vector<16x8xf32>, vector<16x8xf32>, vector<16x8xf32>, vector<16x8xf32> -> vector<16x32xf32>
    %cst_32 = arith.constant dense<0.000000e+00> : vector<16xf32>
    %112 = vector.multi_reduction <add>, %111, %cst_32 [1] : vector<16x32xf32> to vector<16xf32>
    %113 = vector.shape_cast %112 : vector<16xf32> to vector<16x1xf32>
    %cst_33 = arith.constant 3.200000e+01 : f32
    %114 = vector.broadcast %cst_33 : f32 to vector<16x1xf32>
    %115 = arith.divf %113, %114 : vector<16x1xf32>
    %116 = vector.broadcast %115 : vector<16x1xf32> to vector<16x32xf32>
    %117 = arith.subf %111, %116 : vector<16x32xf32>
    %118 = arith.mulf %117, %117 : vector<16x32xf32>
    %cst_34 = arith.constant dense<0.000000e+00> : vector<16xf32>
    %119 = vector.multi_reduction <add>, %118, %cst_34 [1] : vector<16x32xf32> to vector<16xf32>
    %120 = vector.shape_cast %119 : vector<16xf32> to vector<16x1xf32>
    %cst_35 = arith.constant 3.200000e+01 : f32
    %121 = vector.broadcast %cst_35 : f32 to vector<16x1xf32>
    %122 = arith.divf %120, %121 : vector<16x1xf32>
    %123 = vector.broadcast %115 : vector<16x1xf32> to vector<16x32xf32>
    %124 = arith.subf %111, %123 : vector<16x32xf32>
    %cst_36 = arith.constant 9.99999974E-6 : f32
    %125 = vector.broadcast %cst_36 : f32 to vector<16x1xf32>
    %126 = arith.addf %122, %125 : vector<16x1xf32>
    %127 = math.rsqrt %126 : vector<16x1xf32>
    %128 = vector.broadcast %127 : vector<16x1xf32> to vector<16x32xf32>
    %129 = arith.mulf %124, %128 : vector<16x32xf32>
    %c0_37 = arith.constant 0 : index
    %c0_38 = arith.constant 0 : index
    %c0_39 = arith.constant 0 : index
    %130 = vector.load %arg6[%c0_37, %c0_38, %c0_39] : memref<1x1x32xf32, #tpu.memory_space<vmem>>, vector<1x1x32xf32>
    %131 = vector.shape_cast %130 : vector<1x1x32xf32> to vector<32xf32>
    %132 = vector.shape_cast %131 : vector<32xf32> to vector<1x32xf32>
    %133 = vector.broadcast %132 : vector<1x32xf32> to vector<16x32xf32>
    %134 = arith.mulf %129, %133 : vector<16x32xf32>
    %c0_40 = arith.constant 0 : index
    %c0_41 = arith.constant 0 : index
    %c0_42 = arith.constant 0 : index
    %135 = vector.load %arg7[%c0_40, %c0_41, %c0_42] : memref<1x1x32xf32, #tpu.memory_space<vmem>>, vector<1x1x32xf32>
    %136 = vector.shape_cast %135 : vector<1x1x32xf32> to vector<32xf32>
    %137 = vector.shape_cast %136 : vector<32xf32> to vector<1x32xf32>
    %138 = vector.broadcast %137 : vector<1x32xf32> to vector<16x32xf32>
    %139 = arith.addf %134, %138 : vector<16x32xf32>
    %c0_43 = arith.constant 0 : index
    %c0_44 = arith.constant 0 : index
    %c0_45 = arith.constant 0 : index
    %140 = vector.load %arg8[%c0_43, %c0_44, %c0_45] : memref<1x32x32xf32, #tpu.memory_space<vmem>>, vector<1x32x32xf32>
    %141 = vector.shape_cast %140 : vector<1x32x32xf32> to vector<32x32xf32>
    %cst_46 = arith.constant dense<0.000000e+00> : vector<16x32xf32>
    %142 = tpu.matmul %139, %141, %cst_46 {dimension_numbers = #tpu.dot_dimension_numbers<[1], [0], [0], [1], [0, 0, 1, 1], [], []>} : vector<16x32xf32>, vector<32x32xf32>, vector<16x32xf32> -> vector<16x32xf32>
    %c0_47 = arith.constant 0 : index
    %c0_48 = arith.constant 0 : index
    %c0_49 = arith.constant 0 : index
    %143 = vector.load %arg9[%c0_47, %c0_48, %c0_49] : memref<1x1x32xf32, #tpu.memory_space<vmem>>, vector<1x1x32xf32>
    %144 = vector.shape_cast %143 : vector<1x1x32xf32> to vector<32xf32>
    %145 = vector.shape_cast %144 : vector<32xf32> to vector<1x32xf32>
    %146 = vector.broadcast %145 : vector<1x32xf32> to vector<16x32xf32>
    %147 = arith.addf %142, %146 : vector<16x32xf32>
    %148 = arith.addf %147, %3 : vector<16x32xf32>
    %cst_50 = arith.constant dense<0.000000e+00> : vector<16xf32>
    %149 = vector.multi_reduction <add>, %148, %cst_50 [1] : vector<16x32xf32> to vector<16xf32>
    %150 = vector.shape_cast %149 : vector<16xf32> to vector<16x1xf32>
    %cst_51 = arith.constant 3.200000e+01 : f32
    %151 = vector.broadcast %cst_51 : f32 to vector<16x1xf32>
    %152 = arith.divf %150, %151 : vector<16x1xf32>
    %153 = vector.broadcast %152 : vector<16x1xf32> to vector<16x32xf32>
    %154 = arith.subf %148, %153 : vector<16x32xf32>
    %155 = arith.mulf %154, %154 : vector<16x32xf32>
    %cst_52 = arith.constant dense<0.000000e+00> : vector<16xf32>
    %156 = vector.multi_reduction <add>, %155, %cst_52 [1] : vector<16x32xf32> to vector<16xf32>
    %157 = vector.shape_cast %156 : vector<16xf32> to vector<16x1xf32>
    %cst_53 = arith.constant 3.200000e+01 : f32
    %158 = vector.broadcast %cst_53 : f32 to vector<16x1xf32>
    %159 = arith.divf %157, %158 : vector<16x1xf32>
    %160 = vector.broadcast %152 : vector<16x1xf32> to vector<16x32xf32>
    %161 = arith.subf %148, %160 : vector<16x32xf32>
    %cst_54 = arith.constant 9.99999974E-6 : f32
    %162 = vector.broadcast %cst_54 : f32 to vector<16x1xf32>
    %163 = arith.addf %159, %162 : vector<16x1xf32>
    %164 = math.rsqrt %163 : vector<16x1xf32>
    %165 = vector.broadcast %164 : vector<16x1xf32> to vector<16x32xf32>
    %166 = arith.mulf %161, %165 : vector<16x32xf32>
    %c0_55 = arith.constant 0 : index
    %c0_56 = arith.constant 0 : index
    %c0_57 = arith.constant 0 : index
    %167 = vector.load %arg10[%c0_55, %c0_56, %c0_57] : memref<1x32x128xf32, #tpu.memory_space<vmem>>, vector<1x32x128xf32>
    %168 = vector.shape_cast %167 : vector<1x32x128xf32> to vector<32x128xf32>
    %cst_58 = arith.constant dense<0.000000e+00> : vector<16x128xf32>
    %169 = tpu.matmul %166, %168, %cst_58 {dimension_numbers = #tpu.dot_dimension_numbers<[1], [0], [0], [1], [0, 0, 1, 1], [], []>} : vector<16x32xf32>, vector<32x128xf32>, vector<16x128xf32> -> vector<16x128xf32>
    %c0_59 = arith.constant 0 : index
    %c0_60 = arith.constant 0 : index
    %c0_61 = arith.constant 0 : index
    %170 = vector.load %arg11[%c0_59, %c0_60, %c0_61] : memref<1x1x128xf32, #tpu.memory_space<vmem>>, vector<1x1x128xf32>
    %171 = vector.shape_cast %170 : vector<1x1x128xf32> to vector<128xf32>
    %172 = vector.shape_cast %171 : vector<128xf32> to vector<1x128xf32>
    %173 = vector.broadcast %172 : vector<1x128xf32> to vector<16x128xf32>
    %174 = arith.addf %169, %173 : vector<16x128xf32>
    %175 = arith.mulf %174, %174 : vector<16x128xf32>
    %176 = arith.mulf %174, %175 : vector<16x128xf32>
    %cst_62 = arith.constant 4.471500e-02 : f32
    %177 = vector.broadcast %cst_62 : f32 to vector<16x128xf32>
    %178 = arith.mulf %177, %176 : vector<16x128xf32>
    %179 = arith.addf %174, %178 : vector<16x128xf32>
    %cst_63 = arith.constant 0.797884583 : f32
    %180 = vector.broadcast %cst_63 : f32 to vector<16x128xf32>
    %181 = arith.mulf %180, %179 : vector<16x128xf32>
    %182 = math.tanh %181 : vector<16x128xf32>
    %cst_64 = arith.constant 1.000000e+00 : f32
    %183 = vector.broadcast %cst_64 : f32 to vector<16x128xf32>
    %184 = arith.addf %183, %182 : vector<16x128xf32>
    %cst_65 = arith.constant 5.000000e-01 : f32
    %185 = vector.broadcast %cst_65 : f32 to vector<16x128xf32>
    %186 = arith.mulf %185, %184 : vector<16x128xf32>
    %187 = arith.mulf %174, %186 : vector<16x128xf32>
    %c0_66 = arith.constant 0 : index
    %c0_67 = arith.constant 0 : index
    %c0_68 = arith.constant 0 : index
    %188 = vector.load %arg12[%c0_66, %c0_67, %c0_68] : memref<1x128x32xf32, #tpu.memory_space<vmem>>, vector<1x128x32xf32>
    %189 = vector.shape_cast %188 : vector<1x128x32xf32> to vector<128x32xf32>
    %cst_69 = arith.constant dense<0.000000e+00> : vector<16x32xf32>
    %190 = tpu.matmul %187, %189, %cst_69 {dimension_numbers = #tpu.dot_dimension_numbers<[1], [0], [0], [1], [0, 0, 1, 1], [], []>} : vector<16x128xf32>, vector<128x32xf32>, vector<16x32xf32> -> vector<16x32xf32>
    %c0_70 = arith.constant 0 : index
    %c0_71 = arith.constant 0 : index
    %c0_72 = arith.constant 0 : index
    %191 = vector.load %arg13[%c0_70, %c0_71, %c0_72] : memref<1x1x32xf32, #tpu.memory_space<vmem>>, vector<1x1x32xf32>
    %192 = vector.shape_cast %191 : vector<1x1x32xf32> to vector<32xf32>
    %193 = vector.shape_cast %192 : vector<32xf32> to vector<1x32xf32>
    %194 = vector.broadcast %193 : vector<1x32xf32> to vector<16x32xf32>
    %195 = arith.addf %190, %194 : vector<16x32xf32>
    %196 = arith.addf %195, %148 : vector<16x32xf32>
    %c0_73 = arith.constant 0 : index
    %c0_74 = arith.constant 0 : index
    %197 = vector.load %arg14[%c0_73, %c0_74] : memref<16x32xf32, #tpu.memory_space<vmem>>, vector<16x32xf32>
    tpu.vector_store %arg14[%c0_73, %c0_74], %196 {strides = array<i32>} : memref<16x32xf32, #tpu.memory_space<vmem>>, vector<16x32xf32>,
    return
  }
  func.func @transform_0(%arg0: i32, %arg1: memref<8xi32, #tpu.memory_space<smem>>) -> (i32, i32) {
    %c0_i32 = arith.constant 0 : i32
    %c0_i32_0 = arith.constant 0 : i32
    %c0_i32_1 = arith.constant 0 : i32
    return %c0_i32, %c0_i32_0 : i32, i32
  }
  func.func @transform_1(%arg0: i32, %arg1: memref<8xi32, #tpu.memory_space<smem>>) -> (i32, i32, i32) {
    %c0_i32 = arith.constant 0 : i32
    %c0_i32_0 = arith.constant 0 : i32
    %c0_i32_1 = arith.constant 0 : i32
    %c0_i32_2 = arith.constant 0 : i32
    return %c0_i32, %c0_i32_0, %c0_i32_1 : i32, i32, i32
  }
  func.func @transform_2(%arg0: i32, %arg1: memref<8xi32, #tpu.memory_space<smem>>) -> (i32, i32, i32) {
    %c0_i32 = arith.constant 0 : i32
    %c0_i32_0 = arith.constant 0 : i32
    %c0_i32_1 = arith.constant 0 : i32
    return %arg0, %c0_i32, %c0_i32_0 : i32, i32, i32
  }
  func.func @transform_3(%arg0: i32, %arg1: memref<8xi32, #tpu.memory_space<smem>>) -> (i32, i32, i32) {
    %c0_i32 = arith.constant 0 : i32
    %c0_i32_0 = arith.constant 0 : i32
    %c0_i32_1 = arith.constant 0 : i32
    return %arg0, %c0_i32, %c0_i32_0 : i32, i32, i32
  }
  func.func @transform_4(%arg0: i32, %arg1: memref<8xi32, #tpu.memory_space<smem>>) -> (i32, i32, i32) {
    %c0_i32 = arith.constant 0 : i32
    %c0_i32_0 = arith.constant 0 : i32
    %c0_i32_1 = arith.constant 0 : i32
    return %arg0, %c0_i32, %c0_i32_0 : i32, i32, i32
  }
  func.func @transform_5(%arg0: i32, %arg1: memref<8xi32, #tpu.memory_space<smem>>) -> (i32, i32, i32) {
    %c0_i32 = arith.constant 0 : i32
    %c0_i32_0 = arith.constant 0 : i32
    %c0_i32_1 = arith.constant 0 : i32
    return %arg0, %c0_i32, %c0_i32_0 : i32, i32, i32
  }
  func.func @transform_6(%arg0: i32, %arg1: memref<8xi32, #tpu.memory_space<smem>>) -> (i32, i32, i32) {
    %0 = arith.index_cast %arg0 : i32 to index
    %1 = memref.load %arg1[%0] : memref<8xi32, #tpu.memory_space<smem>>
    %c0_i32 = arith.constant 0 : i32
    %c0_i32_0 = arith.constant 0 : i32
    %c0_i32_1 = arith.constant 0 : i32
    return %1, %c0_i32, %c0_i32_0 : i32, i32, i32
  }
  func.func @transform_7(%arg0: i32, %arg1: memref<8xi32, #tpu.memory_space<smem>>) -> (i32, i32, i32) {
    %0 = arith.index_cast %arg0 : i32 to index
    %1 = memref.load %arg1[%0] : memref<8xi32, #tpu.memory_space<smem>>
    %c0_i32 = arith.constant 0 : i32
    %c0_i32_0 = arith.constant 0 : i32
    %c0_i32_1 = arith.constant 0 : i32
    return %1, %c0_i32, %c0_i32_0 : i32, i32, i32
  }
  func.func @transform_8(%arg0: i32, %arg1: memref<8xi32, #tpu.memory_space<smem>>) -> (i32, i32, i32) {
    %0 = arith.index_cast %arg0 : i32 to index
    %1 = memref.load %arg1[%0] : memref<8xi32, #tpu.memory_space<smem>>
    %c0_i32 = arith.constant 0 : i32
    %c0_i32_0 = arith.constant 0 : i32
    %c0_i32_1 = arith.constant 0 : i32
    return %1, %c0_i32, %c0_i32_0 : i32, i32, i32
  }
  func.func @transform_9(%arg0: i32, %arg1: memref<8xi32, #tpu.memory_space<smem>>) -> (i32, i32, i32) {
    %0 = arith.index_cast %arg0 : i32 to index
    %1 = memref.load %arg1[%0] : memref<8xi32, #tpu.memory_space<smem>>
    %c0_i32 = arith.constant 0 : i32
    %c0_i32_0 = arith.constant 0 : i32
    %c0_i32_1 = arith.constant 0 : i32
    return %1, %c0_i32, %c0_i32_0 : i32, i32, i32
  }
  func.func @transform_10(%arg0: i32, %arg1: memref<8xi32, #tpu.memory_space<smem>>) -> (i32, i32, i32) {
    %0 = arith.index_cast %arg0 : i32 to index
    %1 = memref.load %arg1[%0] : memref<8xi32, #tpu.memory_space<smem>>
    %c0_i32 = arith.constant 0 : i32
    %c0_i32_0 = arith.constant 0 : i32
    %c0_i32_1 = arith.constant 0 : i32
    return %1, %c0_i32, %c0_i32_0 : i32, i32, i32
  }
  func.func @transform_11(%arg0: i32, %arg1: memref<8xi32, #tpu.memory_space<smem>>) -> (i32, i32, i32) {
    %0 = arith.index_cast %arg0 : i32 to index
    %1 = memref.load %arg1[%0] : memref<8xi32, #tpu.memory_space<smem>>
    %c0_i32 = arith.constant 0 : i32
    %c0_i32_0 = arith.constant 0 : i32
    %c0_i32_1 = arith.constant 0 : i32
    return %1, %c0_i32, %c0_i32_0 : i32, i32, i32
  }
  func.func @transform_12(%arg0: i32, %arg1: memref<8xi32, #tpu.memory_space<smem>>) -> (i32, i32) {
    %c0_i32 = arith.constant 0 : i32
    %c0_i32_0 = arith.constant 0 : i32
    %c0_i32_1 = arith.constant 0 : i32
    return %c0_i32, %c0_i32_0 : i32, i32
  }
}

</mosaic_0001>

<bundles_post_ra>
// kernel: forward_pallas.1
= control target key start
LH: loop header
LB: loop body
LE: loop exit
PB: predicated region body
PF: predicated region fallthrough
CT: control target
= control target key end

     0   :  { %s4141_s0 = inlined_call_operand.vmem [shape: s32[8], index: 0, kind: input, shape index: {}]   ;;  %s4142_s1 = inlined_call_operand.vmem [shape: f32[16,32], index: 1, kind: input, shape index: {}]   ;;  %s4143_s2 = inlined_call_operand.hbm [shape: f32[2,8,8], index: 2, kind: input, shape index: {}]   ;;  %s4144_s3 = inlined_call_operand.vmem [shape: f32[8,32,96], index: 3, kind: input, shape index: {}]   ;;  %s4145_s4 = inlined_call_operand.hbm [shape: f32[8,1,96], index: 4, kind: input, shape index: {}]   ;;  %s4146_s5 = inlined_call_operand.hbm [shape: f32[8,1,32], index: 5, kind: input, shape index: {}]   ;;  %s4147_s6 = inlined_call_operand.hbm [shape: f32[8,1,32], index: 6, kind: input, shape index: {}]   ;;  %s4148_s7 = inlined_call_operand.vmem [shape: f32[2,32,32], index: 7, kind: input, shape index: {}]   ;;  %s4149_s8 = inlined_call_operand.vmem [shape: f32[2,1,32], index: 8, kind: input, shape index: {}]   ;;  %s4150_s9 = inlined_call_operand.hbm [shape: f32[2,32,128], index: 9, kind: input, shape index: {}]   ;;  %s4151_s10 = inlined_call_operand.vmem [shape: f32[2,1,128], index: 10, kind: input, shape index: {}]   ;;  %s4152_s11 = inlined_call_operand.vmem [shape: f32[2,128,32], index: 11, kind: input, shape index: {}]   ;;  %s4153_s12 = inlined_call_operand.vmem [shape: f32[2,1,32], index: 12, kind: input, shape index: {}]   ;;  %s4154_s13 = inlined_call_operand.hbm [shape: f32[16,32], index: 13, kind: output, shape index: {}]  }
   0x1   :  { %4166 = sst [smem:[#allocation26_spill]] %s4142_s1  ;;  %s18_s27 = sshll.u32 %s4141_s0, 4  ;;  %s19_s27 = int_to_ptr.vmem [resolvable:$true] %s18_s27 }
   0x2   :  { %4167 = sst [smem:[#allocation27_spill]] %s4144_s3  ;;  %s3175_s28 = scalar_lea.vmem %s19_s27, 16 }
   0x3   :  { %4168 = sst [smem:[#allocation28_spill]] %s4145_s4  ;;  %p3176_p0 = scmp.ne.s32.totalorder %s19_s27, %s3175_s28 }
   0x4   :  { %4169 = sst [smem:[#allocation29_spill]] %s4147_s6  ;;  %p3180_p1 = scmp.lt.s32.totalorder %s19_s27, %s19_s27 }
   0x5   :  { %4170 = sst [smem:[#allocation30_spill]] %s4148_s7  ;;  %p3181_p2 = scmp.lt.s32.totalorder %s3175_s28, %s3175_s28 }
   0x6   :  { %4171 = sst [smem:[#allocation31_spill]] %s4149_s8 }
   0x7   :  { %4172 = sst [smem:[#allocation32_spill]] %s4151_s10  ;;  %p3182_p3 = por %p3181_p2, %p3180_p1 }
   0x8   :  { %4173 = sst [smem:[#allocation33_spill]] %s4152_s11 }
   0x9   :  { %4174 = sst [smem:[#allocation34_spill]] %s4153_s12  ;;  %p3183_p4 = pnand %p3182_p3, %p3176_p0 }
   0xa   :  { %4175 = sst [smem:[#allocation35_spill]] %s4154_s13 }
   0xb   :  { %3186 = shalt.err (!%p3183_p4)  }
   0xc   :  { %s3427_s29 = smov [#allocation3]  }
   0xd   :  { %21 = dma.vmem_to_smem %s19_s27, 16, %s3427_s29, [#allocation2] }
   0xe   :  { %3377 = dma.done.wait [#allocation2], 16 }
   0xf   :  { %3378 = vsyncadd [#allocation2], 4294967280 }
  0x10   :  { %23 = sfence }
  0x11   :  { %24 = vsyncpa [#allocation5], 0 }
  0x12   :  { %25 = vsyncpa [#allocation8], 0 }
  0x13   :  { %27 = vsyncpa [#allocation8 + $0x1], 0 }
  0x14   :  { %28 = vsyncpa [#allocation11], 0 }
  0x15   :  { %30 = vsyncpa [#allocation11 + $0x1], 0 }
  0x16   :  { %31 = vsyncpa [#allocation6], 0  ;;  %s3526_s0 = smov 0   ;;  %s3528_s30 = smov 0  }
  0x17   :  { %s3530_s14 = smov 0   ;;  %s3532_s15 = smov 0  }
  0x18   :  { %s3534_s16 = smov 0   ;;  %s3536_s17 = smov 0  }
  0x19   :  { %s3538_s18 = smov 0  }
  0x1a LB: > { %4176 = sst [smem:[#allocation22_spill]] %s3421_s17  ;;  %s3562_s19 = sadd.s32 1, %s3425_s18   ;;  %s3425_s18 = sphi %s3538_s18, %s4223_s18   ;;  %s3421_s17 = sphi %s3536_s17, %s4226_s17   ;;  %s3417_s16 = sphi %s3534_s16, %s4231_s16   ;;  %s3413_s15 = sphi %s3532_s15, %s4230_s15   ;;  %s3409_s14 = sphi %s3530_s14, %s4229_s14   ;;  %s3405_s30 = sphi %s3528_s30, %s4228_s30   ;;  %s3401_s0 = sphi %s3526_s0, %s4227_s0  }
  0x1b   : > { %4177 = sst [smem:[#allocation23_spill]] %s3562_s19  ;;  %s112_s20 = sadd.s32 1, %s3421_s17 }
  0x1c   : > { %s109_s21 = ssub.s32 %s3425_s18, %s3562_s19  ;;  %p119_p5 = scmp.ne.s32.totalorder %s3421_s17, %s3417_s16 }
  0x1d   : > { %p110_p6 = scmp.eq.s32.totalorder %s109_s21, 0  ;;  %p120_p7 = scmp.eq.s32.totalorder %s3425_s18, 0 }
  0x1e   : > { %s243_s22 = sld [smem:[#allocation3 + %s3425_s18]]  ;;  %s248_s26 = sadd.s32 1, %s3409_s14 }
  0x1f   : > { %s3574_s23 = scalar_select %p110_p6, %s3421_s17, %s112_s20  }
  0x20   : > { %p3576_p9 = por %p120_p7, %p119_p5  ;;  %s244_s25 = sld [smem:[#allocation3 + %s3562_s19]] }
  0x21   : > { %4178 = sst [smem:[#allocation24_spill]] %s3574_s23  ;;  %p255_p10 = scmp.ne.s32.totalorder %s3409_s14, %s3405_s30 }
  0x22   : > { %p4159_p13 = scmp.lt.s32.totalorder %s3425_s18, 8  ;;  %s3593_s29 = sand.u32 1, %s3421_s17  }
  0x23   : > { %p3586_p12 = por %p255_p10, %p120_p7  ;;  %s3596_s21 = sshll.u32 %s3425_s18, 4 }
  0x24   : > { %s4181_s4 = sld [smem:[#allocation28_spill]]  ;;  %s417_s1 = scalar_lea.vmem [#allocation7], %s3593_s29 }
  0x25   : > { %s4180_s27 = scalar_select %p3586_p12, 1, 0 }
  0x26   : > { %s245_s20 = ssub.s32 %s243_s22, %s244_s25  ;;  %s424_s12 = sshll.u32 %s417_s1, 4  ;;  %s425_s12 = int_to_ptr.vmem [resolvable:$true] %s424_s12 }
  0x27   : > { %p246_p0 = scmp.eq.s32.totalorder %s245_s20, 0  ;;  %p3609_p1 = pnand %p4159_p13, %p3576_p9 }
  0x28   : > { %s4184_s25 = sand.u32 1, %s3425_s18  }
  0x29   : > { %s3614_s22 = scalar_select %p246_p0, %s3409_s14, %s248_s26  }
  0x2a   : > { %s3602_s13 = scalar_lea.hbm %s4181_s4, %s3596_s21  ;;  %s3618_s20 = scalar_lea.sflag [#allocation8], %s4184_s25 }
  0x2b   : > { %4183 = sst [smem:[#allocation25_spill]] %s3614_s22  ;;  %s3187_s19 = scalar_lea.hbm %s3602_s13, 16 }
  0x2c   : > { %p3188_p2 = scmp.ne.s32.totalorder %s3602_s13, %s3187_s19  ;;  %p3624_p3 = pneg %p3609_p1 }
  0x2d   : > { %s3192_s26 = scalar_lea.hbm %s4181_s4, 128  ;;  %p3193_p6 = scmp.lt.s32.totalorder %s3602_s13, %s4181_s4 }
  0x2e   : > { %p3190_p4 = pnand %p3624_p3, %p3188_p2  ;;  %p3194_p7 = scmp.lt.s32.totalorder %s3192_s26, %s3187_s19 }
  0x30   : > { %p3191_p5 = pneg %p3190_p4  ;;  %p3195_p9 = por %p3194_p7, %p3193_p6 }
  0x32   : > { %p3196_p10 = pnand %p3195_p9, %p3191_p5 }
  0x34   : > { %3199 = shalt.err (!%p3196_p10)
}
  0x35   : > { %s3200_s25 = scalar_lea.vmem %s425_s12, 16  ;;  %s3428_s11 = smov [#allocation7]  }
  0x36   : > { %p3201_p0 = scmp.ne.s32.totalorder %s425_s12, %s3200_s25  ;;  %s3205_s3 = sshll.u32 %s3428_s11, 4  ;;  %s3206_s3 = int_to_ptr.vmem [resolvable:$false] %s3205_s3 }
  0x37   : > { %s3207_s10 = scalar_lea.vmem %s3206_s3, 32  ;;  %p3208_p2 = scmp.lt.s32.totalorder %s425_s12, %s3206_s3 }
  0x38   : > { %p3203_p11 = pnand %p3201_p0, %p3624_p3  ;;  %p3209_p4 = scmp.lt.s32.totalorder %s3207_s10, %s3200_s25 }
  0x3a   : > { %p3204_p8 = pneg %p3203_p11  ;;  %p3210_p13 = por %p3209_p4, %p3208_p2 }
  0x3c   : > { %p3211_p12 = pnand %p3210_p13, %p3204_p8 }
  0x3e   : > { %3214 = shalt.err (!%p3211_p12)
}
  0x3f   : > { %3032 = dma.hbm_to_vmem [thread:$0]  (!%p3609_p1), %s3602_s13, 16, %s425_s12, %s3618_s20  }
  0x40   : > { %p4186_p11 = scmp.ne.s32.totalorder %s4180_s27, 0  ;;  %p4187_p5 = scmp.lt.s32.totalorder %s3425_s18, 8 }
  0x41   : > { %s4189_s6 = sld [smem:[#allocation29_spill]]  ;;  %s451_s22 = scalar_lea.vmem [#allocation10], %s3593_s29 }
  0x42   : > { %p3647_p6 = pnand %p4187_p5, %p4186_p11  ;;  %s458_s19 = sshll.u32 %s451_s22, 4  ;;  %s459_s19 = int_to_ptr.vmem [resolvable:$true] %s458_s19 }
  0x43   : > { %s3659_s1 = sadd.s32 4294967295, %s3425_s18   ;;  %s4190_s12 = sand.u32 1, %s3425_s18  }
  0x44   : > { %s4188_s3 = scalar_select %p3647_p6, 1, 0 }
  0x45   : > { %s3663_s13 = scalar_lea.sflag [#allocation11], %s4190_s12 }
  0x47   : > { %s3655_s17 = scalar_lea.hbm %s4189_s6, %s3596_s21  ;;  %s3220_s10 = scalar_lea.hbm %s4189_s6, 128 }
  0x48   : > { %s3215_s24 = scalar_lea.hbm %s3655_s17, 16  ;;  %p3221_p7 = scmp.lt.s32.totalorder %s3655_s17, %s4189_s6 }
  0x49   : > { %p3216_p8 = scmp.ne.s32.totalorder %s3655_s17, %s3215_s24  ;;  %p3222_p9 = scmp.lt.s32.totalorder %s3220_s10, %s3215_s24 }
  0x4b   : > { %p3218_p12 = pnand %p3216_p8, %p3624_p3  ;;  %p3223_p10 = por %p3222_p9, %p3221_p7 }
  0x4d   : > { %p3219_p13 = pneg %p3218_p12 }
  0x4f   : > { %p3224_p0 = pnand %p3223_p10, %p3219_p13 }
  0x51   : > { %3227 = shalt.err (!%p3224_p0)
}
  0x52   : > { %s3228_s22 = scalar_lea.vmem %s459_s19, 16  ;;  %s3429_s12 = smov [#allocation10]  }
  0x53   : > { %p3229_p2 = scmp.ne.s32.totalorder %s459_s19, %s3228_s22  ;;  %s3233_s8 = sshll.u32 %s3429_s12, 4  ;;  %s3234_s8 = int_to_ptr.vmem [resolvable:$false] %s3233_s8 }
  0x54   : > { %s3235_s7 = scalar_lea.vmem %s3234_s8, 32  ;;  %p3236_p8 = scmp.lt.s32.totalorder %s459_s19, %s3234_s8 }
  0x55   : > { %p3231_p4 = pnand %p3229_p2, %p3624_p3  ;;  %p3237_p12 = scmp.lt.s32.totalorder %s3235_s7, %s3228_s22 }
  0x57   : > { %p3232_p5 = pneg %p3231_p4  ;;  %p3238_p6 = por %p3237_p12, %p3236_p8 }
  0x59   : > { %p3239_p11 = pnand %p3238_p6, %p3232_p5 }
  0x5b   : > { %3242 = shalt.err (!%p3239_p11)
}
  0x5c   : > { %3038 = dma.hbm_to_vmem [thread:$0]  (!%p3609_p1), %s3655_s17, 16, %s459_s19, %s3663_s13  }
  0x5d   : > { %p4162_p11 = scmp.eq.s32.totalorder %s3659_s1, 0  ;;  %p2728_p6 = scmp.ge.s32.totalorder %s3425_s18, 1 }
  0x5e   : > { %p377_p13 = scmp.lt.s32.totalorder %s3425_s18, 9  ;;  %p4191_p9 = scmp.ne.s32.totalorder %s3417_s16, %s3413_s15 }
  0x5f   : > { %p4193_p0 = scmp.ne.s32.totalorder %s3405_s30, %s3401_s0  ;;  %s3430_s17 = smov [#allocation4]  }
  0x60   : > { %p3691_p10 = por %p4162_p11, %p4191_p9  ;;  %p3704_p4 = pnand %p2728_p6, %p377_p13 }
  0x61   : > { %p3700_p2 = por %p4193_p0, %p4162_p11  ;;  %s392_s19 = sshll.u32 %s3430_s17, 4  ;;  %s393_s19 = int_to_ptr.vmem [resolvable:$true] %s392_s19 }
  0x62   : > { %s4192_s4 = scalar_select %p3691_p10, 1, 0 }
  0x63   : > { %s4194_s7 = scalar_select %p3700_p2, 1, 0 }
  0x64   : > { %s4195_s8 = scalar_select %p3704_p4, 1, 0 }
  0x65   : > { %p3025_p5 = pneg %p3704_p4  ;;  %s3720_s26 = scalar_lea.hbm %s4146_s5, %s3596_s21 }
  0x66   : > { %s434_s25 = scalar_lea.vmem [#allocation9], %s3593_s29  ;;  %s3254_s22 = scalar_lea.vmem %s393_s19, 256 }
  0x67   : > { %p3712_p8 = pnand %p3025_p5, %p4162_p11  ;;  %s441_s10 = sshll.u32 %s434_s25, 4  ;;  %s3724_s10 = int_to_ptr.vmem [resolvable:$true] %s441_s10 }
  0x68   : > { %p3255_p6 = scmp.ne.s32.totalorder %s393_s19, %s3254_s22  ;;  %p3262_p0 = scmp.lt.s32.totalorder %s393_s19, %s393_s19 }
  0x69   : > { %p3245_p12 = pneg %p3712_p8  ;;  %p3263_p5 = scmp.lt.s32.totalorder %s3254_s22, %s3254_s22 }
  0x6b   : > { %p3257_p13 = pnand %p3255_p6, %p3245_p12  ;;  %p3264_p7 = por %p3263_p5, %p3262_p0 }
  0x6d   : > { %p3258_p9 = pneg %p3257_p13 }
  0x6f   : > { %p3265_p11 = pnand %p3264_p7, %p3258_p9 }
  0x71   : > { %3268 = shalt.err (!%p3265_p11)
}
  0x72   : > { %s3431_s12 = smov 128   ;;  %s3432_s29 = smov 8  }
  0x73   : > { %3028 = dma.hbm_to_vmem [thread:$0]  (!%p3712_p8), %s4143_s2, 256, %s393_s19, [#allocation5], %s3431_s12, %s3431_s12, %s3432_s29  }
  0x74   : > { %s3269_s0 = scalar_lea.hbm %s3720_s26, 16  ;;  %s3274_s22 = scalar_lea.hbm %s4146_s5, 128 }
  0x75   : > { %p3270_p12 = scmp.ne.s32.totalorder %s3720_s26, %s3269_s0  ;;  %p3275_p6 = scmp.lt.s32.totalorder %s3720_s26, %s4146_s5 }
  0x76   : > { %p3276_p13 = scmp.lt.s32.totalorder %s3274_s22, %s3269_s0 }
  0x77   : > { %p3272_p7 = pnand %p3270_p12, %p3624_p3 }
  0x78   : > { %p3277_p9 = por %p3276_p13, %p3275_p6 }
  0x79   : > { %p3273_p11 = pneg %p3272_p7 }
  0x7b   : > { %p3278_p0 = pnand %p3277_p9, %p3273_p11 }
  0x7d   : > { %3281 = shalt.err (!%p3278_p0)
}
  0x7e   : > { %s3282_s19 = scalar_lea.vmem %s3724_s10, 16  ;;  %s3433_s15 = smov [#allocation9]  }
  0x7f   : > { %p3283_p8 = scmp.ne.s32.totalorder %s3724_s10, %s3282_s19  ;;  %s3287_s21 = sshll.u32 %s3433_s15, 4  ;;  %s3288_s21 = int_to_ptr.vmem [resolvable:$false] %s3287_s21 }
  0x80   : > { %s3289_s17 = scalar_lea.vmem %s3288_s21, 32  ;;  %p3290_p7 = scmp.lt.s32.totalorder %s3724_s10, %s3288_s21 }
  0x81   : > { %p3285_p5 = pnand %p3283_p8, %p3624_p3  ;;  %p3291_p2 = scmp.lt.s32.totalorder %s3289_s17, %s3282_s19 }
  0x83   : > { %p3286_p12 = pneg %p3285_p5  ;;  %p3292_p10 = por %p3291_p2, %p3290_p7 }
  0x85   : > { %p3293_p4 = pnand %p3292_p10, %p3286_p12 }
  0x87   : > { %3296 = shalt.err (!%p3293_p4)
}
  0x88   : > { %3035 = dma.hbm_to_vmem [thread:$0]  (!%p3609_p1), %s3720_s26, 16, %s3724_s10, %s3618_s20  }
  0x89   : > { %s4197_s6 = sand.u32 1, %s3409_s14   ;;  %p4198_p3 = scmp.ne.s32.totalorder %s4180_s27, 0 }
  0x8a   : > { %s2734_s23 = sshll.u32 %s4197_s6, 5  ;;  %p4199_p10 = scmp.lt.s32.totalorder %s3425_s18, 8 }
  0x8b   : > { %s3012_s11 = scalar_select %p4198_p3, [#allocation3], [#allocation14] }
  0x8c   : > { %s3013_s0 = scalar_select %p4198_p3, %s3425_s18, 0 }
  0x8d   : > { %s4233_s11 = smov (!%p4199_p10, %s3012_s11), [#allocation15]  ;;  %p4200_p2 = pmov %p4199_p10 }
  0x8e   : > { %s487_s24 = scalar_lea.vmem [#allocation12], %s2734_s23  ;;  %p4201_p4 = scmp.ne.s32.totalorder %s4188_s3, 0 }
  0x8f   : > { %s4235_s0 = smov (!%p4200_p2, %s3013_s0), 0  ;;  %s495_s25 = sshll.u32 %s487_s24, 4  ;;  %s3768_s25 = int_to_ptr.vmem [resolvable:$true] %s495_s25 }
  0x90   : > { %s488_s28 = sld [smem:[%s4233_s11 + %s4235_s0]]  ;;  %p3299_p11 = pneg %p4201_p4 }
  0x91   : > { %s3302_s10 = scalar_lea.hbm %s4150_s9, 1024 }
  0x96   : > { %s2787_s22 = sshll.u32 %s488_s28, 9 }
  0x97   : > { %s3773_s20 = scalar_lea.hbm %s4150_s9, %s2787_s22 }
  0x98   : > { %s3297_s27 = scalar_lea.hbm %s3773_s20, 512  ;;  %p3303_p9 = scmp.lt.s32.totalorder %s3773_s20, %s4150_s9 }
  0x99   : > { %p3298_p1 = scmp.ne.s32.totalorder %s3773_s20, %s3297_s27  ;;  %p3304_p0 = scmp.lt.s32.totalorder %s3302_s10, %s3297_s27 }
  0x9b   : > { %p3300_p6 = pnand %p3299_p11, %p3298_p1  ;;  %p3305_p8 = por %p3304_p0, %p3303_p9 }
  0x9d   : > { %p3301_p13 = pneg %p3300_p6 }
  0x9f   : > { %p3306_p5 = pnand %p3305_p8, %p3301_p13 }
  0xa1   : > { %3309 = shalt.err (!%p3306_p5)
}
  0xa2   : > { %s3310_s6 = scalar_lea.vmem %s3768_s25, 512  ;;  %s3434_s23 = smov [#allocation12]  }
  0xa3   : > { %p3311_p12 = scmp.ne.s32.totalorder %s3768_s25, %s3310_s6  ;;  %s3315_s11 = sshll.u32 %s3434_s23, 4  ;;  %s3316_s11 = int_to_ptr.vmem [resolvable:$false] %s3315_s11 }
  0xa4   : > { %s3317_s0 = scalar_lea.vmem %s3316_s11, 1024  ;;  %p3318_p10 = scmp.lt.s32.totalorder %s3768_s25, %s3316_s11 }
  0xa5   : > { %p3313_p7 = pnand %p3311_p12, %p3299_p11  ;;  %p3319_p2 = scmp.lt.s32.totalorder %s3317_s0, %s3310_s6 }
  0xa7   : > { %p3314_p3 = pneg %p3313_p7  ;;  %p3320_p1 = por %p3319_p2, %p3318_p10 }
  0xa9   : > { %p3321_p6 = pnand %p3320_p1, %p3314_p3 }
  0xab   : > { %3324 = shalt.err (!%p3321_p6)
}
  0xac   : > { %3043 = dma.hbm_to_vmem [thread:$0]  (!%p4201_p4), %s3773_s20, 512, %s3768_s25, %s3663_s13, %s3431_s12, %s3431_s12, %s3432_s29  }
  0xad   : > { %p4202_p11 = scmp.ne.s32.totalorder %s4195_s8, 0 }
  0xae   : > { %p4203_p13 = scmp.eq.s32.totalorder (!%p4202_p11), %s3659_s1, 0 }
  0xaf   : > { %533 = sbr.rel (%p4202_p11) target bundleno = 4450 (0x1162), region = 68 }
  0xb4   : > { %3380 = dma.done.wait (%p4203_p13), [#allocation5], 256   ;;  %p4204_p9 = pmov %p4203_p13 }
  0xb5   : > { %s539_s3 = sand.u32 1, %s3659_s1   ;;  %s3805_s28 = sand.u32 1, %s3417_s16  }
  0xb6   : > { %3382 = vsyncadd (%p4204_p9), [#allocation5], 4294967040  ;;  %s540_s24 = scalar_lea.sflag [#allocation8], %s539_s3  ;;  %p4205_p0 = scmp.ne.s32.totalorder %s4192_s4, 0 }
  0xb8   : > { %3384 = dma.done.wait (%p4205_p0), %s540_s24, 32  }
  0xb9   : > { %3386 = vsyncadd (%p4205_p0), %s540_s24, 4294967264  ;;  %s556_s8 = scalar_lea.sflag [#allocation11], %s539_s3 }
  0xba   : > { %3388 = dma.done.wait (%p4205_p0), %s556_s8, 16  }
  0xbb   : > { %3390 = vsyncadd (%p4205_p0), %s556_s8, 4294967280  ;;  %s565_s29 = sand.u32 1, %s3405_s30   ;;  %p4206_p4 = scmp.ne.s32.totalorder %s4194_s7, 0 }
  0xbc   : > { %s2739_s25 = sshll.u32 %s565_s29, 5 }
  0xbd   : > { %s3819_s19 = scalar_lea.vmem [#allocation12], %s2739_s25 }
  0xbe   : > { %3392 = dma.done.wait (%p4206_p4), %s556_s8, 512  }
  0xbf   : > { %3394 = vsyncadd (%p4206_p4), %s556_s8, 4294966784  ;;  %s649_s4 = sld [smem:[#allocation3 + %s3659_s1]]  ;;  %p644_p8 = scmp.lt.s32.totalorder %s3659_s1, 7 }
  0xc0   : > { %s656_s15 = sld [smem:[#allocation3 + %s3659_s1]]  ;;  %p4213_p2 = scmp.ne.s32.totalorder %s3659_s1, 0 }
  0xc1   : > { %s662_s20 = sld [smem:[#allocation3 + %s3659_s1]] }
  0xc2   : > { %s667_s27 = sld [smem:[#allocation3 + %s3659_s1]] }
  0xc3   : > { %s674_s18 = sld [smem:[#allocation3 + %s3659_s1]] }
  0xc4   : > { %s645_s26 = scalar_select %p644_p8, %s3659_s1, 7 }
  0xc5   : > { %p650_p5 = scmp.lt.s32.totalorder %s649_s4, 1  ;;  %s4207_s6 = sld [smem:[#allocation30_spill]] }
  0xc6   : > { %p657_p12 = scmp.lt.s32.totalorder %s656_s15, 1  ;;  %s2788_s10 = sshll.u32 %s645_s26, 5 }
  0xc7   : > { %s4237_s4 = smov (!%p650_p5, %s649_s4), 1  ;;  %p663_p7 = scmp.lt.s32.totalorder %s662_s20, 1 }
  0xc8   : > { %s4239_s15 = smov (!%p657_p12, %s656_s15), 1  ;;  %s2789_s7 = sshll.u32 %s4237_s4, 5 }
  0xc9   : > { %s4241_s20 = smov (!%p663_p7, %s662_s20), 1  ;;  %p668_p3 = scmp.lt.s32.totalorder %s667_s27, 1 }
  0xca   : > { %p675_p10 = scmp.lt.s32.totalorder %s674_s18, 1  ;;  %s4209_s25 = sld [smem:[#allocation32_spill]] }
  0xcb   : > { %s3837_s23 = scalar_lea.vmem %s4207_s6, %s2789_s7  ;;  %s4210_s13 = sld [smem:[#allocation27_spill]] }
  0xcc   : > { %s4243_s27 = smov (!%p668_p3, %s667_s27), 1  ;;  %s4245_s18 = smov (!%p675_p10, %s674_s18), 1 }
  0xcd   : > { %s2790_s7 = sshll.u32 %s4243_s27, 7  ;;  %s4211_s6 = sld [smem:[#allocation33_spill]] }
  0xce   : > { %s4212_s24 = sld [smem:[#allocation34_spill]] }
  0xd0   : > { %s665_s26 = scalar_lea.vmem %s4209_s25, %s4241_s20  ;;  %682 = sbr.rel (%p4213_p2) target bundleno = 217 (0xd9), region = 92 }
  0xd1   : > { %s3852_s22 = scalar_lea.vmem %s4210_s13, %s2788_s10  ;;  %s4214_s10 = sld [smem:[#allocation26_spill]] (!%p4213_p2) }
  0xd3   : > { %s3859_s11 = scalar_lea.vmem %s4211_s6, %s2790_s7 }
  0xd4   : > { %s677_s8 = scalar_lea.vmem %s4212_s24, %s4245_s18 }
  0xd5   : > { %vm685_vm0 = vcmask 261120  }
  0xd7   : > { %v683_v0 = vld [vmem:[%s4214_s10] sm:$0xff]  ;;  %v684_v1 = vld [vmem:[%s4214_s10 + $0x8] sm:$0xff] }
  0xd8   : > { %686 = vst.msk [vmem:[#allocation13] sm:$0xff] %vm685_vm0, %v683_v0  ;;  %687 = vst.msk [vmem:[#allocation13 + $0x8] sm:$0xff] %vm685_vm0, %v684_v1 }
  0xd9 PF: > { %vm690_vm1 = vcmask 261120   ;;  %v721_v16 = vld [vmem:[%s3852_s22 + $0x18] sm:$0xff]  ;;  %v720_v17 = vld [vmem:[%s3852_s22 + $0x10] sm:$0xff]  ;;  %v719_v18 = vld [vmem:[%s3852_s22 + $0x8] sm:$0xff]  ;;  %v3435_v30 = vmov 0.0   ;;  %vm3436_vm2 = vmmov 0  }
  0xda   : > { %2859 = vmatprep.subr.mxu1 %v721_v16  ;;  %v718_v19 = vld [vmem:[%s3852_s22] sm:$0xff]  ;;  %2880 = vmatprep.subr.mxu0 %v3435_v30  ;;  %s4215_s22 = scalar_lea.vmem [#allocation7], %s3805_s28  ;;  %s3437_s27 = smov 96   ;;  %vm815_vm3 = vcmask 64512   ;;  %v3920_v42 = vld [vmem:[#allocation4 + $0x8] sm:$0xff]  ;;  %vm2160_vm4 = vcmask 195584  }
  0xdb   : > { %2860 = vmatpush3.msra.mxu1 %v721_v16  ;;  %2882 = vmatprep.mubr.msk.f32.mxu0 %vm3436_vm2, %v3435_v30  ;;  %v2747_v31 = vld [vmem:[%s4215_s22] ss:$0 sm:$0xff]  ;;  %s3438_s24 = smov 64   ;;  %s3439_s4 = smov 88   ;;  %vm2157_vm5 = vcmask 130048  }
  0xdc   : > { %2861 = vmatprep.subr.mxu1 %v720_v17  ;;  %v3917_v38 = vld [vmem:[#allocation4] sm:$0xff]  ;;  %s3440_s7 = smov 120   ;;  %s3441_s21 = smov 56  }
  0xdd   : > { %2862 = vmatpush3.msra.mxu1 %v720_v17  ;;  %s3442_s17 = smov 80   ;;  %s3443_s6 = smov 112  }
  0xde   : > { %2863 = vmatprep.subr.mxu1 %v719_v18  ;;  %s3444_s0 = smov 48   ;;  %s3445_s3 = smov 72  }
  0xdf   : > { %v3873_v2 = vld [vmem:[#allocation13] sm:$0xff]  ;;  %v3875_v3 = vld [vmem:[#allocation13 + $0x8] sm:$0xff]  ;;  %2864 = vmatpush3.msra.mxu1 %v719_v18  ;;  %s3446_s12 = smov 104   ;;  %s3447_s13 = smov 40  }
  0xe0   : > { %v691_v4 = vsel %vm690_vm1, %v3873_v2, 0.0  ;;  %v694_v5 = vsel %vm690_vm1, %v3875_v3, 0.0  ;;  %2865 = vmatprep.subr.mxu1 %v718_v19  ;;  %s3448_s29 = smov 8   ;;  %s3449_s25 = smov 16  }
  0xe1   : > { %692 = vadd.xlane.f32.xlu0 %v691_v4  ;;  %2866 = vmatpush3.msra.mxu1 %v718_v19  ;;  %s3450_s22 = smov 24   ;;  %p3047_p1 = scmp.eq.s32.totalorder %s3659_s1, 7 }
  0xe2   : > { %2870 = vmatprep.subr.mxu1 %v3435_v30 }
  0xe5   : > { %695 = vadd.xlane.f32.xlu0 %v694_v5 }
 0x16a   : > { %v693_v6 = vpop.xlane.xlu0 %692 }
 0x16b   : > { %v698_v7 = vmul.f32 0.03125, %v693_v6 }
 0x16d   : > { %v700_v8 = vsub.f32 %v3873_v2, %v698_v7 }
 0x16e   : > { %v696_v9 = vpop.xlane.xlu0 %695 }
 0x16f   : > { %v699_v10 = vmul.f32 0.03125, %v696_v9  ;;  %v702_v11 = vmul.f32 %v700_v8, %v700_v8 }
 0x171   : > { %v701_v12 = vsub.f32 %v3875_v3, %v699_v10  ;;  %v704_v13 = vsel %vm690_vm1, %v702_v11, 0.0 }
 0x172   : > { %705 = vadd.xlane.f32.xlu1 %v704_v13 }
 0x173   : > { %v703_v14 = vmul.f32 %v701_v12, %v701_v12 }
 0x175   : > { %v707_v15 = vsel %vm690_vm1, %v703_v14, 0.0 }
 0x176   : > { %708 = vadd.xlane.f32.xlu1 %v707_v15 }
 0x1fb   : > { %v706_v20 = vpop.xlane.xlu1 %705 }
 0x1fc   : > { %v710_v21 = vmul.f32 0.03125, %v706_v20 }
 0x1fe   : > { %v712_v22 = vadd.f32 1e-05, %v710_v21 }
 0x1ff   : > { %v709_v23 = vpop.xlane.xlu1 %708 }
 0x200   : > { %3127 = vrsqrt.f32 %v712_v22  ;;  %v711_v24 = vmul.f32 0.03125, %v709_v23 }
 0x202   : > { %v713_v25 = vadd.f32 1e-05, %v711_v24 }
 0x204   : > { %3129 = vrsqrt.f32 %v713_v25 }
 0x20d   : > { %v3128_v26 = vpop.eup %3127 }
 0x20e   : > { %v716_v27 = vmul.f32 %v3128_v26, %v700_v8 }
 0x210   : > { %2867 = vmatprep.mubr.msk.f32.mxu1 %vm690_vm1, %v716_v27 }
 0x211   : > { %v3130_v28 = vpop.eup %3129 }
 0x212   : > { %v717_v29 = vmul.f32 %v3130_v28, %v701_v12 }
 0x214   : > { %2868 = vmatmul.mubr.msk.f32.vlgmr.msra.gmra.mxu1 %vm690_vm1, %v717_v29 }
 0x215   : > { %2872 = vmatprep.mubr.msk.f32.mxu1 %vm3436_vm2, %v3435_v30 }
 0x2d4   : > { %v2869_v32 = vpop.f32.mrf.mxu1 }
 0x2d5   : > { %v3899_v33 = vadd.f32 %v2869_v32, %v2747_v31 }
 0x2d6   : > { %v801_v34 = vpop.f32.mrf.mxu1 }
 0x2d7   : > { %v3901_v35 = vadd.f32 %v2747_v31, %v801_v34  ;;  %891 = vrot.lane.b32.xlu1 %v3899_v33, %s3437_s27 }
 0x2d9   : > { %813 = vrot.lane.b32.xlu0 %v3901_v35, %s3437_s27  ;;  %s4216_s27 = scalar_lea.vmem [#allocation9], %s3805_s28 }
 0x349   : > { %v892_v37 = vpop.permute.xlu1 %891 }
 0x34b   : > { %v814_v36 = vpop.permute.xlu0 %813 }
 0x34c   : > { %2871 = vmatpush3.xpose.msk.msra.mxu1 %vm815_vm3, %v814_v36 }
 0x34d   : > { %2875 = vmatprep.subr.mxu1 %v3435_v30 }
 0x34f   : > { %2873 = vmatmul.mubr.msk.f32.vlgmr.msra.gmra.mxu1 %vm815_vm3, %v3901_v35 }
 0x350   : > { %2876 = vmatpush3.xpose.msk.msra.mxu1 %vm815_vm3, %v892_v37  ;;  %2877 = vmatprep.mubr.msk.f32.mxu1 %vm3436_vm2, %v3435_v30 }
 0x351   : > { %2885 = vmatprep.subr.mxu1 %v3435_v30 }
 0x353   : > { %2878 = vmatmul.mubr.msk.f32.vlgmr.msra.gmra.mxu1 %vm815_vm3, %v3899_v33 }
 0x354   : > { %2887 = vmatprep.mubr.msk.f32.mxu1 %vm3436_vm2, %v3435_v30 }
 0x40f   : > { %v886_v39 = vpop.f32.mrf.mxu1 }
 0x410   : > { %v887_v40 = vadd.f32 %v886_v39, %v3917_v38 }
 0x411   : > { %v2874_v41 = vpop.f32.mrf.mxu1 }
 0x412   : > { %v967_v43 = vsel %vm815_vm3, %v887_v40, -inf }
 0x413   : > { %968 = vmax.xlane.f32.xlu1 %v967_v43  ;;  %v963_v44 = vpop.f32.mrf.mxu1 }
 0x414   : > { %v964_v45 = vadd.f32 %v963_v44, %v3920_v42 }
 0x415   : > { %v2879_v46 = vpop.f32.mrf.mxu1 }
 0x416   : > { %v970_v47 = vsel %vm815_vm3, %v964_v45, -inf }
 0x417   : > { %971 = vmax.xlane.f32.xlu0 %v970_v47 }
 0x424   : > { %1065 = vrot.lane.b32.xlu1 %v3899_v33, %s3438_s24 }
 0x428   : > { %1143 = vrot.lane.b32.xlu1 %v3901_v35, %s3439_s4 }
 0x42c   : > { %1221 = vrot.lane.b32.xlu1 %v3899_v33, %s3439_s4 }
 0x49c   : > { %v969_v48 = vpop.xlane.xlu1 %968 }
 0x49d   : > { %v973_v49 = vsub.f32 %v887_v40, %v969_v48 }
 0x49f   : > { %v975_v50 = vmul.f32 1.442695, %v973_v49 }
 0x4a0   : > { %v1066_v51 = vpop.permute.xlu1 %1065  ;;  %v972_v52 = vpop.xlane.xlu0 %971 }
 0x4a1   : > { %3131 = vpow2.f32 %v975_v50  ;;  %v974_v53 = vsub.f32 %v964_v45, %v972_v52  ;;  %2886 = vmatpush3.msra.mxu1 %v1066_v51 }
 0x4a2   : > { %2895 = vmatprep.subr.mxu1 %v3435_v30 }
 0x4a3   : > { %v977_v54 = vmul.f32 1.442695, %v974_v53 }
 0x4a4   : > { %v1144_v59 = vpop.permute.xlu1 %1143 }
 0x4a5   : > { %3133 = vpow2.f32 %v977_v54 }
 0x4a8   : > { %v1222_v60 = vpop.permute.xlu1 %1221 }
 0x4ae   : > { %v3132_v55 = vpop.eup %3131 }
 0x4af   : > { %v979_v56 = vsel %vm815_vm3, %v3132_v55, 0.0 }
 0x4b0   : > { %980 = vadd.xlane.f32.xlu0 %v979_v56 }
 0x4b2   : > { %v3134_v57 = vpop.eup %3133 }
 0x4b3   : > { %v982_v58 = vsel %vm815_vm3, %v3134_v57, 0.0 }
 0x4b4   : > { %983 = vadd.xlane.f32.xlu1 %v982_v58 }
 0x4c5   : > { %1219 = vrot.lane.b32.xlu1 %v3899_v33, %s3440_s7 }
 0x4c6   : > { %989 = vrot.lane.b32.xlu0 %v3901_v35, %s3438_s24  ;;  %s4217_s24 = scalar_lea.vmem [#allocation10], %s3805_s28 }
 0x4ca   : > { %1141 = vrot.lane.b32.xlu0 %v3901_v35, %s3440_s7  ;;  %s4218_s7 = sld [smem:[#allocation31_spill]] }
 0x539   : > { %v981_v61 = vpop.xlane.xlu0 %980 }
 0x53a   : > { %3135 = vrcp.f32 %v981_v61 }
 0x53d   : > { %v984_v62 = vpop.xlane.xlu1 %983  ;;  %v990_v63 = vpop.permute.xlu0 %989 }
 0x53e   : > { %3137 = vrcp.f32 %v984_v62  ;;  %2881 = vmatpush3.msra.mxu0 %v990_v63 }
 0x53f   : > { %2890 = vmatprep.subr.mxu0 %v3435_v30 }
 0x541   : > { %v1142_v6 = vpop.permute.xlu0 %1141  ;;  %v1220_v7 = vpop.permute.xlu1 %1219 }
 0x547   : > { %v3136_v0 = vpop.eup %3135 }
 0x548   : > { %v987_v1 = vmul.f32 %v3136_v0, %v3132_v55 }
 0x54a   : > { %2883 = vmatmul.mubr.msk.f32.vlgmr.msra.gmra.mxu0 %vm815_vm3, %v987_v1 }
 0x54b   : > { %v3138_v4 = vpop.eup %3137  ;;  %2891 = vmatpush3.xpose.msk.msra.mxu0 %vm815_vm3, %v1144_v59  ;;  %2892 = vmatprep.mubr.msk.f32.mxu0 %vm3436_vm2, %v3435_v30 }
 0x54c   : > { %v988_v5 = vmul.f32 %v3138_v4, %v3134_v57  ;;  %2900 = vmatprep.subr.mxu0 %v3435_v30 }
 0x54e   : > { %2888 = vmatmul.mubr.msk.f32.vlgmr.msra.gmra.mxu1 %vm815_vm3, %v988_v5  ;;  %2893 = vmatmul.mubr.msk.f32.vlgmr.msra.gmra.mxu0 %vm815_vm3, %v1142_v6 }
 0x54f   : > { %2896 = vmatpush3.xpose.msk.msra.mxu1 %vm815_vm3, %v1222_v60  ;;  %2897 = vmatprep.mubr.msk.f32.mxu1 %vm3436_vm2, %v3435_v30 }
 0x550   : > { %2905 = vmatprep.subr.mxu1 %v3435_v30  ;;  %2902 = vmatprep.mubr.msk.f32.mxu0 %vm3436_vm2, %v3435_v30 }
 0x552   : > { %2898 = vmatmul.mubr.msk.f32.vlgmr.msra.gmra.mxu1 %vm815_vm3, %v1220_v7 }
 0x553   : > { %2907 = vmatprep.mubr.msk.f32.mxu1 %vm3436_vm2, %v3435_v30 }
 0x60a   : > { %v3951_v8 = vpop.f32.mrf.mxu0 }
 0x60c   : > { %v2884_v9 = vpop.f32.mrf.mxu0 }
 0x60e   : > { %v3953_v10 = vpop.f32.mrf.mxu1  ;;  %v1215_v11 = vpop.f32.mrf.mxu0 }
 0x60f   : > { %v1216_v12 = vadd.f32 %v1215_v11, %v3917_v38 }
 0x610   : > { %v2889_v13 = vpop.f32.mrf.mxu1  ;;  %v2894_v14 = vpop.f32.mrf.mxu0 }
 0x611   : > { %v1297_v15 = vsel %vm815_vm3, %v1216_v12, -inf }
 0x612   : > { %1298 = vmax.xlane.f32.xlu0 %v1297_v15  ;;  %v1293_v16 = vpop.f32.mrf.mxu1 }
 0x613   : > { %v1294_v17 = vadd.f32 %v1293_v16, %v3920_v42 }
 0x614   : > { %v2899_v18 = vpop.f32.mrf.mxu1 }
 0x615   : > { %v1300_v19 = vsel %vm815_vm3, %v1294_v17, -inf }
 0x616   : > { %1301 = vmax.xlane.f32.xlu1 %v1300_v19 }
 0x627   : > { %1395 = vrot.lane.b32.xlu1 %v3899_v33, %s3441_s21 }
 0x628   : > { %1319 = vrot.lane.b32.xlu0 %v3901_v35, %s3441_s21  ;;  %s4219_s21 = scalar_lea.vmem %s4218_s7, %s4239_s15 }
 0x62b   : > { %1473 = vrot.lane.b32.xlu1 %v3901_v35, %s3442_s17 }
 0x62f   : > { %1551 = vrot.lane.b32.xlu1 %v3899_v33, %s3442_s17  ;;  %s3451_s17 = smov [#allocation13]  }
 0x633   : > { %1549 = vrot.lane.b32.xlu1 %v3899_v33, %s3443_s6 }
 0x69b   : > { %v1299_v20 = vpop.xlane.xlu0 %1298 }
 0x69c   : > { %v1303_v21 = vsub.f32 %v1216_v12, %v1299_v20 }
 0x69e   : > { %v1305_v22 = vmul.f32 1.442695, %v1303_v21 }
 0x69f   : > { %v1320_v23 = vpop.permute.xlu0 %1319  ;;  %v1302_v24 = vpop.xlane.xlu1 %1301 }
 0x6a0   : > { %3139 = vpow2.f32 %v1305_v22  ;;  %v1304_v25 = vsub.f32 %v1294_v17, %v1302_v24  ;;  %2901 = vmatpush3.msra.mxu0 %v1320_v23 }
 0x6a1   : > { %2910 = vmatprep.subr.mxu0 %v3435_v30 }
 0x6a2   : > { %v1307_v26 = vmul.f32 1.442695, %v1304_v25 }
 0x6a3   : > { %v1396_v27 = vpop.permute.xlu1 %1395 }
 0x6a4   : > { %3141 = vpow2.f32 %v1307_v26  ;;  %2906 = vmatpush3.msra.mxu1 %v1396_v27 }
 0x6a5   : > { %2915 = vmatprep.subr.mxu1 %v3435_v30 }
 0x6a7   : > { %v1474_v37 = vpop.permute.xlu1 %1473 }
 0x6ab   : > { %v1552_v43 = vpop.permute.xlu1 %1551 }
 0x6ad   : > { %v3140_v28 = vpop.eup %3139 }
 0x6ae   : > { %v1309_v29 = vsel %vm815_vm3, %v3140_v28, 0.0 }
 0x6af   : > { %1310 = vadd.xlane.f32.xlu0 %v1309_v29  ;;  %v1550_v46 = vpop.permute.xlu1 %1549 }
 0x6b1   : > { %v3142_v31 = vpop.eup %3141 }
 0x6b2   : > { %v1312_v32 = vsel %vm815_vm3, %v3142_v31, 0.0 }
 0x6b3   : > { %1313 = vadd.xlane.f32.xlu0 %v1312_v32 }
 0x6c9   : > { %1471 = vrot.lane.b32.xlu0 %v3901_v35, %s3443_s6  ;;  %s2545_s6 = sshll.u32 %s3451_s17, 4  ;;  %s2546_s6 = int_to_ptr.vmem [resolvable:$true] %s2545_s6 }
 0x6ca   : > { %p3332_p9 = scmp.lt.s32.totalorder %s2546_s6, %s2546_s6 }
 0x738   : > { %v1311_v34 = vpop.xlane.xlu0 %1310 }
 0x739   : > { %3143 = vrcp.f32 %v1311_v34 }
 0x73c   : > { %v1314_v36 = vpop.xlane.xlu0 %1313 }
 0x73d   : > { %3145 = vrcp.f32 %v1314_v36 }
 0x740   : > { %v1472_v45 = vpop.permute.xlu0 %1471 }
 0x746   : > { %v3144_v39 = vpop.eup %3143 }
 0x747   : > { %v1317_v40 = vmul.f32 %v3144_v39, %v3140_v28 }
 0x749   : > { %2903 = vmatmul.mubr.msk.f32.vlgmr.msra.gmra.mxu0 %vm815_vm3, %v1317_v40 }
 0x74a   : > { %v3146_v41 = vpop.eup %3145  ;;  %2911 = vmatpush3.xpose.msk.msra.mxu0 %vm815_vm3, %v1474_v37  ;;  %2912 = vmatprep.mubr.msk.f32.mxu0 %vm3436_vm2, %v3435_v30 }
 0x74b   : > { %v1318_v44 = vmul.f32 %v3146_v41, %v3142_v31  ;;  %2920 = vmatprep.subr.mxu0 %v3435_v30 }
 0x74d   : > { %2908 = vmatmul.mubr.msk.f32.vlgmr.msra.gmra.mxu1 %vm815_vm3, %v1318_v44  ;;  %2913 = vmatmul.mubr.msk.f32.vlgmr.msra.gmra.mxu0 %vm815_vm3, %v1472_v45 }
 0x74e   : > { %2916 = vmatpush3.xpose.msk.msra.mxu1 %vm815_vm3, %v1552_v43  ;;  %2917 = vmatprep.mubr.msk.f32.mxu1 %vm3436_vm2, %v3435_v30 }
 0x74f   : > { %2925 = vmatprep.subr.mxu1 %v3435_v30  ;;  %2922 = vmatprep.mubr.msk.f32.mxu0 %vm3436_vm2, %v3435_v30 }
 0x751   : > { %2918 = vmatmul.mubr.msk.f32.vlgmr.msra.gmra.mxu1 %vm815_vm3, %v1550_v46 }
 0x752   : > { %2927 = vmatprep.mubr.msk.f32.mxu1 %vm3436_vm2, %v3435_v30 }
 0x809   : > { %v3985_v47 = vpop.f32.mrf.mxu0 }
 0x80b   : > { %v2904_v48 = vpop.f32.mrf.mxu0 }
 0x80d   : > { %v3987_v49 = vpop.f32.mrf.mxu1  ;;  %v1545_v50 = vpop.f32.mrf.mxu0 }
 0x80e   : > { %v1546_v51 = vadd.f32 %v1545_v50, %v3917_v38 }
 0x80f   : > { %v2909_v52 = vpop.f32.mrf.mxu1  ;;  %v2914_v53 = vpop.f32.mrf.mxu0 }
 0x810   : > { %v1627_v54 = vsel %vm815_vm3, %v1546_v51, -inf }
 0x811   : > { %1628 = vmax.xlane.f32.xlu0 %v1627_v54  ;;  %v1623_v55 = vpop.f32.mrf.mxu1 }
 0x812   : > { %v1624_v56 = vadd.f32 %v1623_v55, %v3920_v42 }
 0x813   : > { %v2919_v57 = vpop.f32.mrf.mxu1 }
 0x814   : > { %v1630_v58 = vsel %vm815_vm3, %v1624_v56, -inf }
 0x815   : > { %1631 = vmax.xlane.f32.xlu1 %v1630_v58 }
 0x826   : > { %1725 = vrot.lane.b32.xlu1 %v3899_v33, %s3444_s0 }
 0x827   : > { %1649 = vrot.lane.b32.xlu0 %v3901_v35, %s3444_s0  ;;  %s3325_s0 = scalar_lea.vmem %s2546_s6, 256 }
 0x828   : > { %p3326_p6 = scmp.ne.s32.totalorder %s2546_s6, %s3325_s0  ;;  %p3333_p0 = scmp.lt.s32.totalorder %s3325_s0, %s3325_s0 }
 0x82a   : > { %1803 = vrot.lane.b32.xlu1 %v3901_v35, %s3445_s3  ;;  %p3327_p11 = pnand %p3326_p6, %p3047_p1  ;;  %p3334_p4 = por %p3333_p0, %p3332_p9 }
 0x82c   : > { %p3328_p13 = pneg %p3327_p11 }
 0x82e   : > { %1881 = vrot.lane.b32.xlu1 %v3899_v33, %s3445_s3  ;;  %p3335_p8 = pnand %p3334_p4, %p3328_p13 }
 0x832   : > { %1879 = vrot.lane.b32.xlu1 %v3899_v33, %s3446_s12 }
 0x89a   : > { %v1629_v59 = vpop.xlane.xlu0 %1628 }
 0x89b   : > { %v1633_v60 = vsub.f32 %v1546_v51, %v1629_v59 }
 0x89d   : > { %v1635_v61 = vmul.f32 1.442695, %v1633_v60 }
 0x89e   : > { %v1650_v62 = vpop.permute.xlu0 %1649  ;;  %v1632_v63 = vpop.xlane.xlu1 %1631 }
 0x89f   : > { %3147 = vpow2.f32 %v1635_v61  ;;  %v1634_v0 = vsub.f32 %v1624_v56, %v1632_v63  ;;  %2921 = vmatpush3.msra.mxu0 %v1650_v62 }
 0x8a0   : > { %2930 = vmatprep.subr.mxu0 %v3435_v30 }
 0x8a1   : > { %v1637_v1 = vmul.f32 1.442695, %v1634_v0 }
 0x8a2   : > { %v1726_v4 = vpop.permute.xlu1 %1725 }
 0x8a3   : > { %3149 = vpow2.f32 %v1637_v1  ;;  %2926 = vmatpush3.msra.mxu1 %v1726_v4 }
 0x8a4   : > { %2935 = vmatprep.subr.mxu1 %v3435_v30 }
 0x8a6   : > { %v1804_v13 = vpop.permute.xlu1 %1803 }
 0x8aa   : > { %v1882_v17 = vpop.permute.xlu1 %1881 }
 0x8ac   : > { %v3148_v5 = vpop.eup %3147 }
 0x8ad   : > { %v1639_v6 = vsel %vm815_vm3, %v3148_v5, 0.0 }
 0x8ae   : > { %1640 = vadd.xlane.f32.xlu0 %v1639_v6  ;;  %v1880_v20 = vpop.permute.xlu1 %1879 }
 0x8b0   : > { %v3150_v7 = vpop.eup %3149 }
 0x8b1   : > { %v1642_v9 = vsel %vm815_vm3, %v3150_v7, 0.0 }
 0x8b2   : > { %1643 = vadd.xlane.f32.xlu0 %v1642_v9 }
 0x8c8   : > { %1801 = vrot.lane.b32.xlu0 %v3901_v35, %s3446_s12 }
 0x937   : > { %v1641_v11 = vpop.xlane.xlu0 %1640 }
 0x938   : > { %3151 = vrcp.f32 %v1641_v11 }
 0x93b   : > { %v1644_v12 = vpop.xlane.xlu0 %1643 }
 0x93c   : > { %3153 = vrcp.f32 %v1644_v12 }
 0x93f   : > { %v1802_v19 = vpop.permute.xlu0 %1801 }
 0x945   : > { %v3152_v14 = vpop.eup %3151 }
 0x946   : > { %v1647_v15 = vmul.f32 %v3152_v14, %v3148_v5 }
 0x948   : > { %2923 = vmatmul.mubr.msk.f32.vlgmr.msra.gmra.mxu0 %vm815_vm3, %v1647_v15 }
 0x949   : > { %v3154_v16 = vpop.eup %3153  ;;  %2931 = vmatpush3.xpose.msk.msra.mxu0 %vm815_vm3, %v1804_v13  ;;  %2932 = vmatprep.mubr.msk.f32.mxu0 %vm3436_vm2, %v3435_v30 }
 0x94a   : > { %v1648_v18 = vmul.f32 %v3154_v16, %v3150_v7  ;;  %2940 = vmatprep.subr.mxu0 %v3435_v30 }
 0x94c   : > { %2928 = vmatmul.mubr.msk.f32.vlgmr.msra.gmra.mxu1 %vm815_vm3, %v1648_v18  ;;  %2933 = vmatmul.mubr.msk.f32.vlgmr.msra.gmra.mxu0 %vm815_vm3, %v1802_v19  ;;  %v2209_v18 = vld [vmem:[%s3837_s23 + $0x10] sm:$0xff]  ;;  %v2208_v19 = vld [vmem:[%s3837_s23 + $0x8] sm:$0xff] }
 0x94d   : > { %2936 = vmatpush3.xpose.msk.msra.mxu1 %vm815_vm3, %v1882_v17  ;;  %2937 = vmatprep.mubr.msk.f32.mxu1 %vm3436_vm2, %v3435_v30  ;;  %v2210_v17 = vld [vmem:[%s3837_s23 + $0x18] sm:$0xff] }
 0x94e   : > { %2945 = vmatprep.subr.mxu1 %v3435_v30  ;;  %2942 = vmatprep.mubr.msk.f32.mxu0 %vm3436_vm2, %v3435_v30 }
 0x950   : > { %2938 = vmatmul.mubr.msk.f32.vlgmr.msra.gmra.mxu1 %vm815_vm3, %v1880_v20  ;;  %v2207_v20 = vld [vmem:[%s3837_s23] sm:$0xff] }
 0x951   : > { %2947 = vmatprep.mubr.msk.f32.mxu1 %vm3436_vm2, %v3435_v30 }
 0xa08   : > { %v1721_v21 = vpop.f32.mrf.mxu0 }
 0xa0a   : > { %v2924_v22 = vpop.f32.mrf.mxu0 }
 0xa0c   : > { %v1797_v23 = vpop.f32.mrf.mxu1  ;;  %v1875_v24 = vpop.f32.mrf.mxu0 }
 0xa0d   : > { %v1876_v25 = vadd.f32 %v1875_v24, %v3917_v38 }
 0xa0e   : > { %v2929_v26 = vpop.f32.mrf.mxu1  ;;  %v2934_v27 = vpop.f32.mrf.mxu0 }
 0xa0f   : > { %v1957_v28 = vsel %vm815_vm3, %v1876_v25, -inf }
 0xa10   : > { %1958 = vmax.xlane.f32.xlu0 %v1957_v28  ;;  %v1953_v29 = vpop.f32.mrf.mxu1  ;;  %v2774_v28 = vld [vmem:[%s4216_s27] ss:$0 sm:$0xff] }
 0xa11   : > { %v1954_v31 = vadd.f32 %v1953_v29, %v3920_v42 }
 0xa12   : > { %v2939_v32 = vpop.f32.mrf.mxu1 }
 0xa13   : > { %v1960_v34 = vsel %vm815_vm3, %v1954_v31, -inf }
 0xa14   : > { %1961 = vmax.xlane.f32.xlu1 %v1960_v34 }
 0xa25   : > { %2055 = vrot.lane.b32.xlu1 %v3899_v33, %s3447_s13 }
 0xa29   : > { %2133 = vrot.lane.b32.xlu1 %v3985_v47, %s3448_s29 }
 0xa2d   : > { %2135 = vrot.lane.b32.xlu1 %v3987_v49, %s3448_s29 }
 0xa31   : > { %2143 = vrot.lane.b32.xlu1 %v1797_v23, %s3449_s25 }
 0xa99   : > { %v1959_v30 = vpop.xlane.xlu0 %1958 }
 0xa9a   : > { %v1963_v38 = vsub.f32 %v1876_v25, %v1959_v30 }
 0xa9c   : > { %v1965_v36 = vmul.f32 1.442695, %v1963_v38 }
 0xa9d   : > { %v1962_v42 = vpop.xlane.xlu1 %1961 }
 0xa9e   : > { %3155 = vpow2.f32 %v1965_v36  ;;  %v1964_v37 = vsub.f32 %v1954_v31, %v1962_v42  ;;  %v2775_v31 = vld [vmem:[%s4217_s24] ss:$0 sm:$0xff] }
 0xaa0   : > { %v1967_v39 = vmul.f32 1.442695, %v1964_v37  ;;  %v2776_v37 = vld [vmem:[%s4219_s21] ss:$0 sm:$0xff] }
 0xaa1   : > { %v2056_v40 = vpop.permute.xlu1 %2055 }
 0xaa2   : > { %3157 = vpow2.f32 %v1967_v39  ;;  %2946 = vmatpush3.msra.mxu1 %v2056_v40 }
 0xaa3   : > { %2950 = vmatprep.subr.mxu1 %v2210_v17 }
 0xaa5   : > { %v2134_v55 = vpop.permute.xlu1 %2133 }
 0xaa6   : > { %v2155_v58 = vsel %vm815_vm3, %v3951_v8, %v2134_v55  ;;  %v2329_v55 = vld [vmem:[%s3819_s19 + $0x10] sm:$0xff] }
 0xaa9   : > { %v2136_v56 = vpop.permute.xlu1 %2135 }
 0xaaa   : > { %v2156_v0 = vsel %vm815_vm3, %v3953_v10, %v2136_v56  ;;  %v2328_v56 = vld [vmem:[%s3819_s19 + $0x8] sm:$0xff] }
 0xaab   : > { %v3156_v33 = vpop.eup %3155 }
 0xaac   : > { %v1969_v41 = vsel %vm815_vm3, %v3156_v33, 0.0 }
 0xaad   : > { %1970 = vadd.xlane.f32.xlu0 %v1969_v41  ;;  %v2144_v59 = vpop.permute.xlu1 %2143 }
 0xaae   : > { %v2159_v1 = vsel %vm2157_vm5, %v2156_v0, %v2144_v59 }
 0xaaf   : > { %v3158_v43 = vpop.eup %3157 }
 0xab0   : > { %v1972_v44 = vsel %vm815_vm3, %v3158_v43, 0.0 }
 0xab1   : > { %1973 = vadd.xlane.f32.xlu0 %v1972_v44 }
 0xac7   : > { %1979 = vrot.lane.b32.xlu0 %v3901_v35, %s3447_s13 }
 0xacb   : > { %2141 = vrot.lane.b32.xlu0 %v1721_v21, %s3449_s25 }
 0xb36   : > { %v1971_v45 = vpop.xlane.xlu0 %1970 }
 0xb37   : > { %3159 = vrcp.f32 %v1971_v45 }
 0xb3a   : > { %v1974_v46 = vpop.xlane.xlu0 %1973 }
 0xb3b   : > { %3161 = vrcp.f32 %v1974_v46 }
 0xb3e   : > { %v1980_v47 = vpop.permute.xlu0 %1979 }
 0xb3f   : > { %2941 = vmatpush3.msra.mxu0 %v1980_v47 }
 0xb42   : > { %v2142_v57 = vpop.permute.xlu0 %2141 }
 0xb43   : > { %v2158_v60 = vsel %vm2157_vm5, %v2155_v58, %v2142_v57  ;;  %v2327_v57 = vld [vmem:[%s3819_s19] sm:$0xff] }
 0xb44   : > { %v3160_v48 = vpop.eup %3159 }
 0xb45   : > { %v1977_v49 = vmul.f32 %v3160_v48, %v3156_v33 }
 0xb47   : > { %2943 = vmatmul.mubr.msk.f32.vlgmr.msra.gmra.mxu0 %vm815_vm3, %v1977_v49 }
 0xb48   : > { %v3162_v50 = vpop.eup %3161 }
 0xb49   : > { %v1978_v51 = vmul.f32 %v3162_v50, %v3158_v43 }
 0xb4b   : > { %2948 = vmatmul.mubr.msk.f32.vlgmr.msra.gmra.mxu1 %vm815_vm3, %v1978_v51 }
 0xb4c   : > { %2951 = vmatpush3.msra.mxu1 %v2210_v17  ;;  %v2441_v17 = vld [vmem:[%s3859_s11 + $0x20] sm:$0xff] }
 0xb4d   : > { %2952 = vmatprep.subr.mxu1 %v2209_v18 }
 0xb4e   : > { %2953 = vmatpush3.msra.mxu1 %v2209_v18  ;;  %v2440_v18 = vld [vmem:[%s3859_s11 + $0x18] sm:$0xff] }
 0xb4f   : > { %2954 = vmatprep.subr.mxu1 %v2208_v19 }
 0xb50   : > { %2955 = vmatpush3.msra.mxu1 %v2208_v19  ;;  %v2439_v19 = vld [vmem:[%s3859_s11 + $0x10] sm:$0xff] }
 0xb51   : > { %2956 = vmatprep.subr.mxu1 %v2207_v20 }
 0xb52   : > { %2957 = vmatpush3.msra.mxu1 %v2207_v20  ;;  %v2438_v20 = vld [vmem:[%s3859_s11 + $0x8] sm:$0xff] }
 0xc07   : > { %v2051_v52 = vpop.f32.mrf.mxu0 }
 0xc08   : > { %2149 = vrot.lane.b32.xlu0 %v2051_v52, %s3450_s22 }
 0xc09   : > { %v2944_v53 = vpop.f32.mrf.mxu0 }
 0xc0b   : > { %v2127_v35 = vpop.f32.mrf.mxu1 }
 0xc0c   : > { %2151 = vrot.lane.b32.xlu1 %v2127_v35, %s3450_s22 }
 0xc0d   : > { %v2949_v54 = vpop.f32.mrf.mxu1 }
 0xc0e   : > { %v2330_v54 = vld [vmem:[%s3819_s19 + $0x18] sm:$0xff] }
 0xc0f   : > { %2961 = vmatprep.subr.mxu1 %v2330_v54 }
 0xc7a   : > { %v2150_v61 = vpop.permute.xlu0 %2149 }
 0xc7b   : > { %v2161_v62 = vsel %vm2160_vm4, %v2158_v60, %v2150_v61 }
 0xc7c   : > { %v2163_v63 = vsel %vm690_vm1, %v2161_v62, 0.0 }
 0xc7d   : > { %2164 = vadd.xlane.f32.xlu0 %v2163_v63 }
 0xc7e   : > { %v2152_v4 = vpop.permute.xlu1 %2151 }
 0xc7f   : > { %v2162_v5 = vsel %vm2160_vm4, %v2159_v1, %v2152_v4 }
 0xc80   : > { %v2166_v6 = vsel %vm690_vm1, %v2162_v5, 0.0 }
 0xc81   : > { %2167 = vadd.xlane.f32.xlu1 %v2166_v6  ;;  %v2452_v6 = vld [vmem:[%s3859_s11 + $0x78] sm:$0xff] }
 0xc82   : > { %2972 = vmatprep.subr.mxu0 %v2452_v6 }
 0xc83   : > { %2973 = vmatpush3.msra.mxu0 %v2452_v6 }
 0xd06   : > { %v2165_v8 = vpop.xlane.xlu0 %2164 }
 0xd07   : > { %v2169_v7 = vmul.f32 0.03125, %v2165_v8  ;;  %v2451_v8 = vld [vmem:[%s3859_s11 + $0x70] sm:$0xff] }
 0xd08   : > { %2974 = vmatprep.subr.mxu0 %v2451_v8 }
 0xd09   : > { %v2171_v9 = vsub.f32 %v2161_v62, %v2169_v7  ;;  %2975 = vmatpush3.msra.mxu0 %v2451_v8  ;;  %v2450_v7 = vld [vmem:[%s3859_s11 + $0x68] sm:$0xff] }
 0xd0a   : > { %v2168_v11 = vpop.xlane.xlu1 %2167  ;;  %2976 = vmatprep.subr.mxu0 %v2450_v7 }
 0xd0b   : > { %v2170_v12 = vmul.f32 0.03125, %v2168_v11  ;;  %v2173_v13 = vmul.f32 %v2171_v9, %v2171_v9  ;;  %2977 = vmatpush3.msra.mxu0 %v2450_v7  ;;  %v2448_v11 = vld [vmem:[%s3859_s11 + $0x58] sm:$0xff] }
 0xd0d   : > { %v2172_v14 = vsub.f32 %v2162_v5, %v2170_v12  ;;  %v2175_v10 = vsel %vm690_vm1, %v2173_v13, 0.0  ;;  %v2447_v12 = vld [vmem:[%s3859_s11 + $0x50] sm:$0xff]  ;;  %v2446_v13 = vld [vmem:[%s3859_s11 + $0x48] sm:$0xff] }
 0xd0e   : > { %2176 = vadd.xlane.f32.xlu0 %v2175_v10  ;;  %v2444_v10 = vld [vmem:[%s3859_s11 + $0x38] sm:$0xff] }
 0xd0f   : > { %v2174_v15 = vmul.f32 %v2172_v14, %v2172_v14 }
 0xd11   : > { %v2178_v16 = vsel %vm690_vm1, %v2174_v15, 0.0  ;;  %v2443_v15 = vld [vmem:[%s3859_s11 + $0x30] sm:$0xff] }
 0xd12   : > { %2179 = vadd.xlane.f32.xlu0 %v2178_v16  ;;  %v2442_v16 = vld [vmem:[%s3859_s11 + $0x28] sm:$0xff] }
 0xd97   : > { %v2177_v21 = vpop.xlane.xlu0 %2176 }
 0xd98   : > { %v2181_v22 = vmul.f32 0.03125, %v2177_v21  ;;  %v2437_v21 = vld [vmem:[%s3859_s11] sm:$0xff] }
 0xd9a   : > { %v2183_v23 = vadd.f32 1e-05, %v2181_v22  ;;  %v2779_v22 = vld [vmem:[%s665_s26] ss:$0 sm:$0xff] }
 0xd9b   : > { %v2180_v24 = vpop.xlane.xlu0 %2179 }
 0xd9c   : > { %3163 = vrsqrt.f32 %v2183_v23  ;;  %v2182_v25 = vmul.f32 0.03125, %v2180_v24 }
 0xd9e   : > { %v2184_v26 = vadd.f32 1e-05, %v2182_v25 }
 0xda0   : > { %3165 = vrsqrt.f32 %v2184_v26 }
 0xda9   : > { %v3164_v27 = vpop.eup %3163 }
 0xdaa   : > { %v2187_v29 = vmul.f32 %v3164_v27, %v2171_v9  ;;  %v2449_v9 = vld [vmem:[%s3859_s11 + $0x60] sm:$0xff] }
 0xdab   : > { %2978 = vmatprep.subr.mxu0 %v2449_v9 }
 0xdac   : > { %v2196_v32 = vmul.f32 %v2774_v28, %v2187_v29  ;;  %2979 = vmatpush3.msra.mxu0 %v2449_v9 }
 0xdad   : > { %v3166_v34 = vpop.eup %3165  ;;  %2980 = vmatprep.subr.mxu0 %v2448_v11 }
 0xdae   : > { %v2188_v30 = vmul.f32 %v3166_v34, %v2172_v14  ;;  %v2205_v38 = vadd.f32 %v2775_v31, %v2196_v32  ;;  %2981 = vmatpush3.msra.mxu0 %v2448_v11  ;;  %v2445_v14 = vld [vmem:[%s3859_s11 + $0x40] sm:$0xff] }
 0xdaf   : > { %2982 = vmatprep.subr.mxu0 %v2447_v12 }
 0xdb0   : > { %v2197_v36 = vmul.f32 %v2774_v28, %v2188_v30  ;;  %2958 = vmatprep.mubr.msk.f32.mxu1 %vm690_vm1, %v2205_v38  ;;  %2983 = vmatpush3.msra.mxu0 %v2447_v12 }
 0xdb1   : > { %2984 = vmatprep.subr.mxu0 %v2446_v13 }
 0xdb2   : > { %v2206_v42 = vadd.f32 %v2775_v31, %v2197_v36  ;;  %2985 = vmatpush3.msra.mxu0 %v2446_v13 }
 0xdb3   : > { %2986 = vmatprep.subr.mxu0 %v2445_v14 }
 0xdb4   : > { %2959 = vmatmul.mubr.msk.f32.vlgmr.msra.gmra.mxu1 %vm690_vm1, %v2206_v42  ;;  %2987 = vmatpush3.msra.mxu0 %v2445_v14 }
 0xdb5   : > { %2962 = vmatpush3.msra.mxu1 %v2330_v54  ;;  %2988 = vmatprep.subr.mxu0 %v2444_v10 }
 0xdb6   : > { %2963 = vmatprep.subr.mxu1 %v2329_v55  ;;  %2989 = vmatpush3.msra.mxu0 %v2444_v10 }
 0xdb7   : > { %2964 = vmatpush3.msra.mxu1 %v2329_v55  ;;  %2990 = vmatprep.subr.mxu0 %v2443_v15 }
 0xdb8   : > { %2965 = vmatprep.subr.mxu1 %v2328_v56  ;;  %2991 = vmatpush3.msra.mxu0 %v2443_v15 }
 0xdb9   : > { %2966 = vmatpush3.msra.mxu1 %v2328_v56  ;;  %2992 = vmatprep.subr.mxu0 %v2442_v16 }
 0xdba   : > { %2967 = vmatprep.subr.mxu1 %v2327_v57  ;;  %2993 = vmatpush3.msra.mxu0 %v2442_v16 }
 0xdbb   : > { %2968 = vmatpush3.msra.mxu1 %v2327_v57  ;;  %2994 = vmatprep.subr.mxu0 %v2441_v17 }
 0xdbc   : > { %2995 = vmatpush3.msra.mxu0 %v2441_v17 }
 0xdbd   : > { %2996 = vmatprep.subr.mxu0 %v2440_v18 }
 0xdbe   : > { %2997 = vmatpush3.msra.mxu0 %v2440_v18 }
 0xdbf   : > { %2998 = vmatprep.subr.mxu0 %v2439_v19 }
 0xdc0   : > { %2999 = vmatpush3.msra.mxu0 %v2439_v19 }
 0xdc1   : > { %3000 = vmatprep.subr.mxu0 %v2438_v20 }
 0xdc2   : > { %3001 = vmatpush3.msra.mxu0 %v2438_v20 }
 0xdc3   : > { %3002 = vmatprep.subr.mxu0 %v2437_v21 }
 0xdc4   : > { %3003 = vmatpush3.msra.mxu0 %v2437_v21 }
 0xe74   : > { %v2960_v39 = vpop.f32.mrf.mxu1 }
 0xe75   : > { %v2296_v40 = vadd.f32 %v2960_v39, %v2776_v37 }
 0xe76   : > { %v2290_v33 = vpop.f32.mrf.mxu1 }
 0xe77   : > { %v4057_v41 = vadd.f32 %v2296_v40, %v3875_v3  ;;  %v2291_v43 = vadd.f32 %v2776_v37, %v2290_v33 }
 0xe79   : > { %v4060_v44 = vadd.f32 %v2291_v43, %v3873_v2  ;;  %v2304_v45 = vsel %vm690_vm1, %v4057_v41, 0.0 }
 0xe7a   : > { %2305 = vadd.xlane.f32.xlu1 %v2304_v45 }
 0xe7b   : > { %v2301_v46 = vsel %vm690_vm1, %v4060_v44, 0.0 }
 0xe7c   : > { %2302 = vadd.xlane.f32.xlu0 %v2301_v46 }
 0xf03   : > { %v2306_v47 = vpop.xlane.xlu1 %2305 }
 0xf04   : > { %v2308_v48 = vmul.f32 0.03125, %v2306_v47 }
 0xf05   : > { %v2303_v49 = vpop.xlane.xlu0 %2302 }
 0xf06   : > { %v2310_v3 = vsub.f32 %v4057_v41, %v2308_v48  ;;  %v2307_v50 = vmul.f32 0.03125, %v2303_v49  ;;  %v2782_v48 = vld [vmem:[%s677_s8] ss:$0 sm:$0xff] }
 0xf08   : > { %v2309_v2 = vsub.f32 %v4060_v44, %v2307_v50  ;;  %v2312_v51 = vmul.f32 %v2310_v3, %v2310_v3 }
 0xf0a   : > { %v2316_v52 = vsel %vm690_vm1, %v2312_v51, 0.0  ;;  %v2311_v53 = vmul.f32 %v2309_v2, %v2309_v2 }
 0xf0b   : > { %2317 = vadd.xlane.f32.xlu1 %v2316_v52 }
 0xf0c   : > { %v2313_v35 = vsel %vm690_vm1, %v2311_v53, 0.0 }
 0xf0d   : > { %2314 = vadd.xlane.f32.xlu0 %v2313_v35 }
 0xf94   : > { %v2318_v58 = vpop.xlane.xlu1 %2317 }
 0xf95   : > { %v2320_v59 = vmul.f32 0.03125, %v2318_v58 }
 0xf96   : > { %v2315_v60 = vpop.xlane.xlu0 %2314 }
 0xf97   : > { %v2322_v61 = vadd.f32 1e-05, %v2320_v59  ;;  %v2319_v62 = vmul.f32 0.03125, %v2315_v60 }
 0xf99   : > { %v2321_v63 = vadd.f32 1e-05, %v2319_v62  ;;  %3167 = vrsqrt.f32 %v2322_v61 }
 0xf9b   : > { %3169 = vrsqrt.f32 %v2321_v63 }
 0xfa6   : > { %v3168_v0 = vpop.eup %3167 }
 0xfa7   : > { %v2326_v5 = vmul.f32 %v3168_v0, %v2310_v3 }
 0xfa8   : > { %v3170_v1 = vpop.eup %3169 }
 0xfa9   : > { %v2325_v4 = vmul.f32 %v3170_v1, %v2309_v2 }
 0xfab   : > { %2969 = vmatprep.mubr.msk.f32.mxu1 %vm690_vm1, %v2325_v4 }
 0xfac   : > { %2970 = vmatmul.mubr.msk.f32.vlgmr.msra.gmra.mxu1 %vm690_vm1, %v2326_v5 }
0x106c   : > { %v2971_v23 = vpop.f32.mrf.mxu1 }
0x106d   : > { %v2416_v24 = vadd.f32 %v2971_v23, %v2779_v22 }
0x106e   : > { %v2410_v25 = vpop.f32.mrf.mxu1 }
0x106f   : > { %v2420_v26 = vmul.f32 %v2416_v24, %v2416_v24  ;;  %v2411_v27 = vadd.f32 %v2779_v22, %v2410_v25 }
0x1071   : > { %v2422_v28 = vmul.f32 %v2420_v26, %v2416_v24  ;;  %v2419_v29 = vmul.f32 %v2411_v27, %v2411_v27 }
0x1073   : > { %v2424_v31 = vmul.f32 0.044715, %v2422_v28  ;;  %v2421_v32 = vmul.f32 %v2419_v29, %v2411_v27 }
0x1075   : > { %v2426_v34 = vadd.f32 %v2424_v31, %v2416_v24  ;;  %v2423_v30 = vmul.f32 0.044715, %v2421_v32 }
0x1077   : > { %v2428_v38 = vmul.f32 0.7978846, %v2426_v34  ;;  %v2425_v36 = vadd.f32 %v2423_v30, %v2411_v27 }
0x1079   : > { %3171 = vtanh.f32 %v2428_v38  ;;  %v2427_v42 = vmul.f32 0.7978846, %v2425_v36 }
0x107b   : > { %3173 = vtanh.f32 %v2427_v42 }
0x1086   : > { %v3172_v37 = vpop.eup %3171 }
0x1087   : > { %v2432_v39 = vadd.f32 1.0, %v3172_v37 }
0x1088   : > { %v3174_v40 = vpop.eup %3173 }
0x1089   : > { %v2431_v33 = vadd.f32 1.0, %v3174_v40  ;;  %v2434_v43 = vmul.f32 0.5, %v2432_v39 }
0x108b   : > { %v2433_v45 = vmul.f32 0.5, %v2431_v33  ;;  %v2436_v47 = vmul.f32 %v2434_v43, %v2416_v24 }
0x108d   : > { %v2435_v46 = vmul.f32 %v2433_v45, %v2411_v27 }
0x108f   : > { %3004 = vmatprep.mubr.f32.mxu0 %v2435_v46 }
0x1090   : > { %3005 = vmatmul.mubr.f32.vlgmr.msra.gmra.mxu0 %v2436_v47 }
0x1150   : > { %v3006_v49 = vpop.f32.mrf.mxu0 }
0x1151   : > { %v2532_v3 = vadd.f32 %v3006_v49, %v2782_v48 }
0x1152   : > { %v2526_v50 = vpop.f32.mrf.mxu0 }
0x1153   : > { %v2536_v2 = vadd.f32 %v2532_v3, %v4057_v41  ;;  %v2527_v51 = vadd.f32 %v2782_v48, %v2526_v50 }
0x1155   : > { %2538 = vst.msk [vmem:[#allocation13 + $0x8] sm:$0xff] %vm690_vm1, %v2536_v2  ;;  %v2535_v52 = vadd.f32 %v2527_v51, %v4060_v44 }
0x1157   : > { %2537 = vst.msk [vmem:[#allocation13] sm:$0xff] %vm690_vm1, %v2535_v52 }
0x1158   : > { %3338 = shalt.err (!%p3335_p8)
}
0x1159   : > { %s3452_s18 = smov 128   ;;  %s4222_s12 = sld [smem:[#allocation35_spill]] }
0x115f   : > { %3022 = dma.vmem_to_hbm [thread:$0]  (%p3047_p1), %s2546_s6, 256, %s4222_s12, [#allocation6], %s3452_s18, %s3452_s18, %s3448_s29  }
0x1160   : > { %3396 = dma.done.wait (%p3047_p1), [#allocation6], 256  }
0x1161   : > { %3398 = vsyncadd (%p3047_p1), [#allocation6], 4294967040 }
0x1162 PF: > { %s4223_s18 = sld [smem:[#allocation23_spill]]  ;;  %s4227_s0 = smov %s3405_s30 }
0x1163   : > { %s4224_s13 = sld [smem:[#allocation25_spill]]  ;;  %s4228_s30 = smov %s3409_s14 }
0x1164   : > { %s4225_s25 = sld [smem:[#allocation22_spill]]  ;;  %s4230_s15 = smov %s3417_s16 }
0x1165   : > { %s4226_s17 = sld [smem:[#allocation24_spill]] }
0x1168   : > { %p34_p5 = scmp.ge.s32.totalorder %s4223_s18, 10  }
0x1169   : > { %s4229_s14 = smov %s4224_s13 }
0x116a   : > { %s4231_s16 = smov %s4225_s25  ;;  %36 = sbr.rel (!%p34_p5) target bundleno = 26 (0x1a), region = 167 }
0x116f   :  { %2561 = vsyncpa [#allocation5], 1 }
0x1170   :  { %2563 = vsyncpa [#allocation5 + $0x1], 1 }
0x1171   :  { %2564 = vsyncpa [#allocation8], 1 }
0x1172   :  { %2566 = vsyncpa [#allocation8 + $0x1], 1 }
0x1173   :  { %2567 = vsyncpa [#allocation11], 1 }
0x1174   :  { %2569 = vsyncpa [#allocation11 + $0x1], 1 }
0x1175   :  { %2570 = vsyncpa [#allocation6], 1 }
0x1176   :  { %2572 = vsyncpa [#allocation6 + $0x1], 1 }

</bundles_post_ra>
